<compile_context>
chip_gen: v5e
topology: v5e:2x2
jax: 0.10.0
libtpu: 0.0.40
codegen_flags: <defaults>
</compile_context>

<pallas_src>
import math
import functools

import jax
import jax.numpy as jnp
from jax.experimental import pallas as pl
from jax.experimental.pallas import tpu as pltpu

# Architecture (fixed by the PyTorch module): layer i maps DIMS[i] -> DIMS[i+1]
IN_DIM = 500
DIMS = [500, 100, 100, 100, 50, 1]
# Lane/sublane-friendly padded dims (zero padding preserves the math exactly).
PDIMS = [512, 128, 128, 128, 64, 1]


def _fcn_kernel(x_ref,
                b1_ref, b2_ref, b3_ref, b4_ref, b5_ref,
                w1_ref, w2_ref, w3_ref, w4_ref, w5_ref,
                o_ref):
    """One grid step = one group of G networks. Full batch B lives in VMEM."""
    g_size = o_ref.shape[-1]            # networks per grid step (static)
    h1_w = w1_ref.shape[-1] // g_size   # padded layer-1 width (128)
    base = pl.program_id(0) * g_size    # first network id handled by this step

    x = x_ref[...]                                             # (B, 512) bf16

    # Layer 1 for all G networks at once: lane-stacked weights fill the MXU.
    h1_all = jnp.dot(x, w1_ref[...],
                     preferred_element_type=jnp.float32)       # (B, G*128) f32

    outs = []
    for g in range(g_size):            # small static G -> unrolled
        n = base + g                   # global network index (for resident biases)
        h = h1_all[:, g * h1_w:(g + 1) * h1_w]                           # (B, 128)
        h = jnp.maximum(h + b1_ref[pl.ds(n, 1), :], 0.0).astype(jnp.bfloat16)
        h = jnp.dot(h, w2_ref[g], preferred_element_type=jnp.float32)
        h = jnp.maximum(h + b2_ref[pl.ds(n, 1), :], 0.0).astype(jnp.bfloat16)
        h = jnp.dot(h, w3_ref[g], preferred_element_type=jnp.float32)
        h = jnp.maximum(h + b3_ref[pl.ds(n, 1), :], 0.0).astype(jnp.bfloat16)
        h = jnp.dot(h, w4_ref[g], preferred_element_type=jnp.float32)
        h = jnp.maximum(h + b4_ref[pl.ds(n, 1), :], 0.0).astype(jnp.bfloat16)
        out = jnp.dot(h, w5_ref[g], preferred_element_type=jnp.float32)  # (B, 1)
        outs.append(out + b5_ref[pl.ds(n, 1), :])
    o_ref[...] = jnp.concatenate(outs, axis=1)                 # (B, G)


def prepare_params(weights, biases, group_size):
    """Pad to lane-friendly dims, pad the network axis to a multiple of
    group_size, cast weights to bf16, and lane-stack the layer-1 weights."""
    N = weights[0].shape[0]
    n_groups = -(-N // group_size)
    n_pad = n_groups * group_size

    pw, pb = [], []
    for i in range(5):
        din, dout = DIMS[i], DIMS[i + 1]
        pin, pout = PDIMS[i], PDIMS[i + 1]
        w = jnp.pad(weights[i], ((0, n_pad - N), (0, pin - din), (0, pout - dout)))
        b = jnp.pad(biases[i], ((0, n_pad - N), (0, pout - dout)))
        pw.append(w.astype(jnp.bfloat16))
        pb.append(b.astype(jnp.float32))

    # Lane-stack layer-1 weights per group: (n_pad, 512, 128) -> (n_groups, 512, G*128)
    w1 = pw[0].reshape(n_groups, group_size, PDIMS[0], PDIMS[1])
    w1 = jnp.transpose(w1, (0, 2, 1, 3)).reshape(n_groups, PDIMS[0],
                                                 group_size * PDIMS[1])
    pw[0] = w1
    return tuple(pw), tuple(pb)


@functools.partial(jax.jit, static_argnames=("num_networks",))
def batched_fcn_forward(x, prep_weights, prep_biases, *, num_networks):
    """
    x:            (B, 500) float32
    prep_weights: output of prepare_params (bf16, padded, layer-1 lane-stacked)
    prep_biases:  output of prepare_params (f32, padded)
    returns:      (B,) float32 == max over networks of the scalar head output
    """
    B = x.shape[0]
    w1s, w2, w3, w4, w5 = prep_weights
    n_groups = w1s.shape[0]
    g_size = w1s.shape[2] // PDIMS[1]
    n_pad = w2.shape[0]

    x_p = jnp.pad(x, ((0, 0), (0, PDIMS[0] - IN_DIM))).astype(jnp.bfloat16)

    in_specs = [pl.BlockSpec((B, PDIMS[0]), lambda n: (0, 0))]        # x (resident)
    for i in range(5):                                                # biases (resident)
        in_specs.append(pl.BlockSpec((n_pad, PDIMS[i + 1]), lambda n: (0, 0)))
    # layer-1 stacked weights: one big lane-dense block per group
    in_specs.append(pl.BlockSpec((None, PDIMS[0], g_size * PDIMS[1]),
                                 lambda n: (n, 0, 0)))
    # layers 2..5: grouped per-network weights, streamed in bf16
    for i in range(1, 5):
        in_specs.append(pl.BlockSpec((g_size, PDIMS[i], PDIMS[i + 1]),
                                     lambda n: (n, 0, 0)))

    out_spec = pl.BlockSpec((None, B, g_size), lambda n: (n, 0, 0))

    out = pl.pallas_call(
        _fcn_kernel,
        out_shape=jax.ShapeDtypeStruct((n_groups, B, g_size), jnp.float32),
        grid_spec=pltpu.PrefetchScalarGridSpec(
            num_scalar_prefetch=0,
            grid=(n_groups,),
            in_specs=in_specs,
            out_specs=out_spec,
        ),
        compiler_params=pltpu.CompilerParams(
            dimension_semantics=("parallel",),   # network axis is independent
        ),
    )(x_p, *prep_biases, w1s, w2, w3, w4, w5)

    # (n_groups, B, G) -> (B, n_pad); drop phantom (padded) networks; max.
    per_net = jnp.transpose(out, (1, 0, 2)).reshape(B, n_groups * g_size)
    return jnp.max(per_net[:, :num_networks], axis=1)


def init_params(key, num_networks):
    """Deterministic init mirroring the PyTorch module:
    kaiming_uniform_(a=sqrt(5)) per-network weight => U(-1/sqrt(fan_in), +1/sqrt(fan_in));
    biases zero-initialized. Stored directly in (N, in, out) layout."""
    weights, biases = [], []
    for i in range(5):
        din, dout = DIMS[i], DIMS[i + 1]
        key, sub = jax.random.split(key)
        bound = 1.0 / math.sqrt(din)
        w = jax.random.uniform(sub, (num_networks, din, dout),
                               minval=-bound, maxval=bound, dtype=jnp.float32)
        b = jnp.zeros((num_networks, dout), dtype=jnp.float32)
        weights.append(w)
        biases.append(b)
    return tuple(weights), tuple(biases)


def reference_forward(x, weights, biases):
    """Pure-JAX f32 reference of BatchedFCN.forward for sanity checking."""
    N = weights[0].shape[0]
    h = jnp.broadcast_to(x[:, None, :], (x.shape[0], N, x.shape[1]))   # (B, N, 500)
    for i in range(5):
        h = jnp.einsum('bni,nio->bno', h, weights[i]) + biases[i][None, :, :]
        if i < 4:
            h = jnp.maximum(h, 0.0)
    return jnp.max(h[..., 0], axis=1)                                  # (B,)


if __name__ == "__main__":
    key = jax.random.PRNGKey(0)
    num_networks = 6        # not a multiple of the group size -> exercises padding
    batch = 2
    group_size = 4

    kp, kx = jax.random.split(key)
    weights, biases = init_params(kp, num_networks)
    x = jax.random.normal(kx, (batch, IN_DIM), dtype=jnp.float32)

    prep_w, prep_b = prepare_params(weights, biases, group_size)

    out = batched_fcn_forward(x, prep_w, prep_b, num_networks=num_networks)
    out = jax.block_until_ready(out)

    ref = reference_forward(x, weights, biases)
    assert out.shape == (batch,), out.shape
    # bf16 weight/activation streaming => ~1e-2-level differences vs f32 reference
    assert jnp.allclose(out, ref, atol=5e-2, rtol=5e-2), (out, ref)

    print("KERNEL_OK")
</pallas_src>

<mosaic_0001>
module attributes {stable_mosaic.version = 11 : i64} {
  func.func @_fcn_kernel(%arg0: i32, %arg1: memref<2x512xbf16, #tpu.memory_space<vmem>>, %arg2: memref<8x128xf32, #tpu.memory_space<vmem>>, %arg3: memref<8x128xf32, #tpu.memory_space<vmem>>, %arg4: memref<8x128xf32, #tpu.memory_space<vmem>>, %arg5: memref<8x64xf32, #tpu.memory_space<vmem>>, %arg6: memref<8x1xf32, #tpu.memory_space<vmem>>, %arg7: memref<1x512x512xbf16, #tpu.memory_space<vmem>>, %arg8: memref<4x128x128xbf16, #tpu.memory_space<vmem>>, %arg9: memref<4x128x128xbf16, #tpu.memory_space<vmem>>, %arg10: memref<4x128x64xbf16, #tpu.memory_space<vmem>>, %arg11: memref<4x64x1xbf16, #tpu.memory_space<vmem>>, %arg12: memref<1x2x4xf32, #tpu.memory_space<vmem>>) attributes {dimension_semantics = [#tpu.dimension_semantics<parallel>], iteration_bounds = array<i64: 2>, scalar_prefetch = 0 : i64, scratch_operands = 0 : i64, tpu.core_type = #tpu.core_type<tc>, window_params = [{pipeline_mode = #tpu.pipeline_mode<synchronous>, transform_indices = @transform_0, window_bounds = array<i64: 2, 512>}, {pipeline_mode = #tpu.pipeline_mode<synchronous>, transform_indices = @transform_1, window_bounds = array<i64: 8, 128>}, {pipeline_mode = #tpu.pipeline_mode<synchronous>, transform_indices = @transform_2, window_bounds = array<i64: 8, 128>}, {pipeline_mode = #tpu.pipeline_mode<synchronous>, transform_indices = @transform_3, window_bounds = array<i64: 8, 128>}, {pipeline_mode = #tpu.pipeline_mode<synchronous>, transform_indices = @transform_4, window_bounds = array<i64: 8, 64>}, {pipeline_mode = #tpu.pipeline_mode<synchronous>, transform_indices = @transform_5, window_bounds = array<i64: 8, 1>}, {transform_indices = @transform_6, window_bounds = array<i64: 1, 512, 512>}, {transform_indices = @transform_7, window_bounds = array<i64: 4, 128, 128>}, {transform_indices = @transform_8, window_bounds = array<i64: 4, 128, 128>}, {transform_indices = @transform_9, window_bounds = array<i64: 4, 128, 64>}, {transform_indices = @transform_10, window_bounds = array<i64: 4, 64, 1>}, {transform_indices = @transform_11, window_bounds = array<i64: 1, 2, 4>}]} {
    %c4_i32 = arith.constant 4 : i32
    %0 = arith.muli %arg0, %c4_i32 : i32
    %c0 = arith.constant 0 : index
    %c0_0 = arith.constant 0 : index
    %1 = vector.load %arg1[%c0, %c0_0] : memref<2x512xbf16, #tpu.memory_space<vmem>>, vector<2x512xbf16>
    %c0_1 = arith.constant 0 : index
    %c0_2 = arith.constant 0 : index
    %c0_3 = arith.constant 0 : index
    %2 = vector.load %arg7[%c0_1, %c0_2, %c0_3] : memref<1x512x512xbf16, #tpu.memory_space<vmem>>, vector<1x512x512xbf16>
    %3 = vector.shape_cast %2 : vector<1x512x512xbf16> to vector<512x512xbf16>
    %cst = arith.constant dense<0.000000e+00> : vector<2x512xf32>
    %4 = tpu.matmul %1, %3, %cst {dimension_numbers = #tpu.dot_dimension_numbers<[1], [0], [0], [1], [0, 0, 1, 1], [], []>} : vector<2x512xbf16>, vector<512x512xbf16>, vector<2x512xf32> -> vector<2x512xf32>
    %c0_i32 = arith.constant 0 : i32
    %5 = arith.addi %0, %c0_i32 : i32
    %6 = vector.extract_strided_slice %4 {offsets = [0, 0], sizes = [2, 128], strides = [1, 1]} : vector<2x512xf32> to vector<2x128xf32>
    %7 = arith.index_cast %5 : i32 to index
    %c0_4 = arith.constant 0 : index
    %8 = vector.load %arg2[%7, %c0_4] : memref<8x128xf32, #tpu.memory_space<vmem>>, vector<1x128xf32>
    %9 = vector.broadcast %8 : vector<1x128xf32> to vector<2x128xf32>
    %10 = arith.addf %6, %9 : vector<2x128xf32>
    %cst_5 = arith.constant 0.000000e+00 : f32
    %11 = vector.broadcast %cst_5 : f32 to vector<2x128xf32>
    %12 = arith.maximumf %10, %11 : vector<2x128xf32>
    %13 = arith.truncf %12 : vector<2x128xf32> to vector<2x128xbf16>
    %c0_6 = arith.constant 0 : index
    %c0_7 = arith.constant 0 : index
    %c0_8 = arith.constant 0 : index
    %14 = vector.load %arg8[%c0_6, %c0_7, %c0_8] : memref<4x128x128xbf16, #tpu.memory_space<vmem>>, vector<1x128x128xbf16>
    %15 = vector.shape_cast %14 : vector<1x128x128xbf16> to vector<128x128xbf16>
    %cst_9 = arith.constant dense<0.000000e+00> : vector<2x128xf32>
    %16 = tpu.matmul %13, %15, %cst_9 {dimension_numbers = #tpu.dot_dimension_numbers<[1], [0], [0], [1], [0, 0, 1, 1], [], []>} : vector<2x128xbf16>, vector<128x128xbf16>, vector<2x128xf32> -> vector<2x128xf32>
    %17 = arith.index_cast %5 : i32 to index
    %c0_10 = arith.constant 0 : index
    %18 = vector.load %arg3[%17, %c0_10] : memref<8x128xf32, #tpu.memory_space<vmem>>, vector<1x128xf32>
    %19 = vector.broadcast %18 : vector<1x128xf32> to vector<2x128xf32>
    %20 = arith.addf %16, %19 : vector<2x128xf32>
    %cst_11 = arith.constant 0.000000e+00 : f32
    %21 = vector.broadcast %cst_11 : f32 to vector<2x128xf32>
    %22 = arith.maximumf %20, %21 : vector<2x128xf32>
    %23 = arith.truncf %22 : vector<2x128xf32> to vector<2x128xbf16>
    %c0_12 = arith.constant 0 : index
    %c0_13 = arith.constant 0 : index
    %c0_14 = arith.constant 0 : index
    %24 = vector.load %arg9[%c0_12, %c0_13, %c0_14] : memref<4x128x128xbf16, #tpu.memory_space<vmem>>, vector<1x128x128xbf16>
    %25 = vector.shape_cast %24 : vector<1x128x128xbf16> to vector<128x128xbf16>
    %cst_15 = arith.constant dense<0.000000e+00> : vector<2x128xf32>
    %26 = tpu.matmul %23, %25, %cst_15 {dimension_numbers = #tpu.dot_dimension_numbers<[1], [0], [0], [1], [0, 0, 1, 1], [], []>} : vector<2x128xbf16>, vector<128x128xbf16>, vector<2x128xf32> -> vector<2x128xf32>
    %27 = arith.index_cast %5 : i32 to index
    %c0_16 = arith.constant 0 : index
    %28 = vector.load %arg4[%27, %c0_16] : memref<8x128xf32, #tpu.memory_space<vmem>>, vector<1x128xf32>
    %29 = vector.broadcast %28 : vector<1x128xf32> to vector<2x128xf32>
    %30 = arith.addf %26, %29 : vector<2x128xf32>
    %cst_17 = arith.constant 0.000000e+00 : f32
    %31 = vector.broadcast %cst_17 : f32 to vector<2x128xf32>
    %32 = arith.maximumf %30, %31 : vector<2x128xf32>
    %33 = arith.truncf %32 : vector<2x128xf32> to vector<2x128xbf16>
    %c0_18 = arith.constant 0 : index
    %c0_19 = arith.constant 0 : index
    %c0_20 = arith.constant 0 : index
    %34 = vector.load %arg10[%c0_18, %c0_19, %c0_20] : memref<4x128x64xbf16, #tpu.memory_space<vmem>>, vector<1x128x64xbf16>
    %35 = vector.shape_cast %34 : vector<1x128x64xbf16> to vector<128x64xbf16>
    %cst_21 = arith.constant dense<0.000000e+00> : vector<2x64xf32>
    %36 = tpu.matmul %33, %35, %cst_21 {dimension_numbers = #tpu.dot_dimension_numbers<[1], [0], [0], [1], [0, 0, 1, 1], [], []>} : vector<2x128xbf16>, vector<128x64xbf16>, vector<2x64xf32> -> vector<2x64xf32>
    %37 = arith.index_cast %5 : i32 to index
    %c0_22 = arith.constant 0 : index
    %38 = vector.load %arg5[%37, %c0_22] : memref<8x64xf32, #tpu.memory_space<vmem>>, vector<1x64xf32>
    %39 = vector.broadcast %38 : vector<1x64xf32> to vector<2x64xf32>
    %40 = arith.addf %36, %39 : vector<2x64xf32>
    %cst_23 = arith.constant 0.000000e+00 : f32
    %41 = vector.broadcast %cst_23 : f32 to vector<2x64xf32>
    %42 = arith.maximumf %40, %41 : vector<2x64xf32>
    %43 = arith.truncf %42 : vector<2x64xf32> to vector<2x64xbf16>
    %c0_24 = arith.constant 0 : index
    %c0_25 = arith.constant 0 : index
    %c0_26 = arith.constant 0 : index
    %44 = vector.load %arg11[%c0_24, %c0_25, %c0_26] : memref<4x64x1xbf16, #tpu.memory_space<vmem>>, vector<1x64x1xbf16>
    %45 = vector.shape_cast %44 : vector<1x64x1xbf16> to vector<64x1xbf16>
    %cst_27 = arith.constant dense<0.000000e+00> : vector<2x1xf32>
    %46 = tpu.matmul %43, %45, %cst_27 {dimension_numbers = #tpu.dot_dimension_numbers<[1], [0], [0], [1], [0, 0, 1, 1], [], []>} : vector<2x64xbf16>, vector<64x1xbf16>, vector<2x1xf32> -> vector<2x1xf32>
    %47 = arith.index_cast %5 : i32 to index
    %c0_28 = arith.constant 0 : index
    %48 = vector.load %arg6[%47, %c0_28] : memref<8x1xf32, #tpu.memory_space<vmem>>, vector<1x1xf32>
    %49 = vector.broadcast %48 : vector<1x1xf32> to vector<2x1xf32>
    %50 = arith.addf %46, %49 : vector<2x1xf32>
    %c1_i32 = arith.constant 1 : i32
    %51 = arith.addi %0, %c1_i32 : i32
    %52 = vector.extract_strided_slice %4 {offsets = [0, 128], sizes = [2, 128], strides = [1, 1]} : vector<2x512xf32> to vector<2x128xf32>
    %53 = arith.index_cast %51 : i32 to index
    %c0_29 = arith.constant 0 : index
    %54 = vector.load %arg2[%53, %c0_29] : memref<8x128xf32, #tpu.memory_space<vmem>>, vector<1x128xf32>
    %55 = vector.broadcast %54 : vector<1x128xf32> to vector<2x128xf32>
    %56 = arith.addf %52, %55 : vector<2x128xf32>
    %cst_30 = arith.constant 0.000000e+00 : f32
    %57 = vector.broadcast %cst_30 : f32 to vector<2x128xf32>
    %58 = arith.maximumf %56, %57 : vector<2x128xf32>
    %59 = arith.truncf %58 : vector<2x128xf32> to vector<2x128xbf16>
    %c1 = arith.constant 1 : index
    %c0_31 = arith.constant 0 : index
    %c0_32 = arith.constant 0 : index
    %60 = vector.load %arg8[%c1, %c0_31, %c0_32] : memref<4x128x128xbf16, #tpu.memory_space<vmem>>, vector<1x128x128xbf16>
    %61 = vector.shape_cast %60 : vector<1x128x128xbf16> to vector<128x128xbf16>
    %cst_33 = arith.constant dense<0.000000e+00> : vector<2x128xf32>
    %62 = tpu.matmul %59, %61, %cst_33 {dimension_numbers = #tpu.dot_dimension_numbers<[1], [0], [0], [1], [0, 0, 1, 1], [], []>} : vector<2x128xbf16>, vector<128x128xbf16>, vector<2x128xf32> -> vector<2x128xf32>
    %63 = arith.index_cast %51 : i32 to index
    %c0_34 = arith.constant 0 : index
    %64 = vector.load %arg3[%63, %c0_34] : memref<8x128xf32, #tpu.memory_space<vmem>>, vector<1x128xf32>
    %65 = vector.broadcast %64 : vector<1x128xf32> to vector<2x128xf32>
    %66 = arith.addf %62, %65 : vector<2x128xf32>
    %cst_35 = arith.constant 0.000000e+00 : f32
    %67 = vector.broadcast %cst_35 : f32 to vector<2x128xf32>
    %68 = arith.maximumf %66, %67 : vector<2x128xf32>
    %69 = arith.truncf %68 : vector<2x128xf32> to vector<2x128xbf16>
    %c1_36 = arith.constant 1 : index
    %c0_37 = arith.constant 0 : index
    %c0_38 = arith.constant 0 : index
    %70 = vector.load %arg9[%c1_36, %c0_37, %c0_38] : memref<4x128x128xbf16, #tpu.memory_space<vmem>>, vector<1x128x128xbf16>
    %71 = vector.shape_cast %70 : vector<1x128x128xbf16> to vector<128x128xbf16>
    %cst_39 = arith.constant dense<0.000000e+00> : vector<2x128xf32>
    %72 = tpu.matmul %69, %71, %cst_39 {dimension_numbers = #tpu.dot_dimension_numbers<[1], [0], [0], [1], [0, 0, 1, 1], [], []>} : vector<2x128xbf16>, vector<128x128xbf16>, vector<2x128xf32> -> vector<2x128xf32>
    %73 = arith.index_cast %51 : i32 to index
    %c0_40 = arith.constant 0 : index
    %74 = vector.load %arg4[%73, %c0_40] : memref<8x128xf32, #tpu.memory_space<vmem>>, vector<1x128xf32>
    %75 = vector.broadcast %74 : vector<1x128xf32> to vector<2x128xf32>
    %76 = arith.addf %72, %75 : vector<2x128xf32>
    %cst_41 = arith.constant 0.000000e+00 : f32
    %77 = vector.broadcast %cst_41 : f32 to vector<2x128xf32>
    %78 = arith.maximumf %76, %77 : vector<2x128xf32>
    %79 = arith.truncf %78 : vector<2x128xf32> to vector<2x128xbf16>
    %c1_42 = arith.constant 1 : index
    %c0_43 = arith.constant 0 : index
    %c0_44 = arith.constant 0 : index
    %80 = vector.load %arg10[%c1_42, %c0_43, %c0_44] : memref<4x128x64xbf16, #tpu.memory_space<vmem>>, vector<1x128x64xbf16>
    %81 = vector.shape_cast %80 : vector<1x128x64xbf16> to vector<128x64xbf16>
    %cst_45 = arith.constant dense<0.000000e+00> : vector<2x64xf32>
    %82 = tpu.matmul %79, %81, %cst_45 {dimension_numbers = #tpu.dot_dimension_numbers<[1], [0], [0], [1], [0, 0, 1, 1], [], []>} : vector<2x128xbf16>, vector<128x64xbf16>, vector<2x64xf32> -> vector<2x64xf32>
    %83 = arith.index_cast %51 : i32 to index
    %c0_46 = arith.constant 0 : index
    %84 = vector.load %arg5[%83, %c0_46] : memref<8x64xf32, #tpu.memory_space<vmem>>, vector<1x64xf32>
    %85 = vector.broadcast %84 : vector<1x64xf32> to vector<2x64xf32>
    %86 = arith.addf %82, %85 : vector<2x64xf32>
    %cst_47 = arith.constant 0.000000e+00 : f32
    %87 = vector.broadcast %cst_47 : f32 to vector<2x64xf32>
    %88 = arith.maximumf %86, %87 : vector<2x64xf32>
    %89 = arith.truncf %88 : vector<2x64xf32> to vector<2x64xbf16>
    %c1_48 = arith.constant 1 : index
    %c0_49 = arith.constant 0 : index
    %c0_50 = arith.constant 0 : index
    %90 = vector.load %arg11[%c1_48, %c0_49, %c0_50] : memref<4x64x1xbf16, #tpu.memory_space<vmem>>, vector<1x64x1xbf16>
    %91 = vector.shape_cast %90 : vector<1x64x1xbf16> to vector<64x1xbf16>
    %cst_51 = arith.constant dense<0.000000e+00> : vector<2x1xf32>
    %92 = tpu.matmul %89, %91, %cst_51 {dimension_numbers = #tpu.dot_dimension_numbers<[1], [0], [0], [1], [0, 0, 1, 1], [], []>} : vector<2x64xbf16>, vector<64x1xbf16>, vector<2x1xf32> -> vector<2x1xf32>
    %93 = arith.index_cast %51 : i32 to index
    %c0_52 = arith.constant 0 : index
    %94 = vector.load %arg6[%93, %c0_52] : memref<8x1xf32, #tpu.memory_space<vmem>>, vector<1x1xf32>
    %95 = vector.broadcast %94 : vector<1x1xf32> to vector<2x1xf32>
    %96 = arith.addf %92, %95 : vector<2x1xf32>
    %c2_i32 = arith.constant 2 : i32
    %97 = arith.addi %0, %c2_i32 : i32
    %98 = vector.extract_strided_slice %4 {offsets = [0, 256], sizes = [2, 128], strides = [1, 1]} : vector<2x512xf32> to vector<2x128xf32>
    %99 = arith.index_cast %97 : i32 to index
    %c0_53 = arith.constant 0 : index
    %100 = vector.load %arg2[%99, %c0_53] : memref<8x128xf32, #tpu.memory_space<vmem>>, vector<1x128xf32>
    %101 = vector.broadcast %100 : vector<1x128xf32> to vector<2x128xf32>
    %102 = arith.addf %98, %101 : vector<2x128xf32>
    %cst_54 = arith.constant 0.000000e+00 : f32
    %103 = vector.broadcast %cst_54 : f32 to vector<2x128xf32>
    %104 = arith.maximumf %102, %103 : vector<2x128xf32>
    %105 = arith.truncf %104 : vector<2x128xf32> to vector<2x128xbf16>
    %c2 = arith.constant 2 : index
    %c0_55 = arith.constant 0 : index
    %c0_56 = arith.constant 0 : index
    %106 = vector.load %arg8[%c2, %c0_55, %c0_56] : memref<4x128x128xbf16, #tpu.memory_space<vmem>>, vector<1x128x128xbf16>
    %107 = vector.shape_cast %106 : vector<1x128x128xbf16> to vector<128x128xbf16>
    %cst_57 = arith.constant dense<0.000000e+00> : vector<2x128xf32>
    %108 = tpu.matmul %105, %107, %cst_57 {dimension_numbers = #tpu.dot_dimension_numbers<[1], [0], [0], [1], [0, 0, 1, 1], [], []>} : vector<2x128xbf16>, vector<128x128xbf16>, vector<2x128xf32> -> vector<2x128xf32>
    %109 = arith.index_cast %97 : i32 to index
    %c0_58 = arith.constant 0 : index
    %110 = vector.load %arg3[%109, %c0_58] : memref<8x128xf32, #tpu.memory_space<vmem>>, vector<1x128xf32>
    %111 = vector.broadcast %110 : vector<1x128xf32> to vector<2x128xf32>
    %112 = arith.addf %108, %111 : vector<2x128xf32>
    %cst_59 = arith.constant 0.000000e+00 : f32
    %113 = vector.broadcast %cst_59 : f32 to vector<2x128xf32>
    %114 = arith.maximumf %112, %113 : vector<2x128xf32>
    %115 = arith.truncf %114 : vector<2x128xf32> to vector<2x128xbf16>
    %c2_60 = arith.constant 2 : index
    %c0_61 = arith.constant 0 : index
    %c0_62 = arith.constant 0 : index
    %116 = vector.load %arg9[%c2_60, %c0_61, %c0_62] : memref<4x128x128xbf16, #tpu.memory_space<vmem>>, vector<1x128x128xbf16>
    %117 = vector.shape_cast %116 : vector<1x128x128xbf16> to vector<128x128xbf16>
    %cst_63 = arith.constant dense<0.000000e+00> : vector<2x128xf32>
    %118 = tpu.matmul %115, %117, %cst_63 {dimension_numbers = #tpu.dot_dimension_numbers<[1], [0], [0], [1], [0, 0, 1, 1], [], []>} : vector<2x128xbf16>, vector<128x128xbf16>, vector<2x128xf32> -> vector<2x128xf32>
    %119 = arith.index_cast %97 : i32 to index
    %c0_64 = arith.constant 0 : index
    %120 = vector.load %arg4[%119, %c0_64] : memref<8x128xf32, #tpu.memory_space<vmem>>, vector<1x128xf32>
    %121 = vector.broadcast %120 : vector<1x128xf32> to vector<2x128xf32>
    %122 = arith.addf %118, %121 : vector<2x128xf32>
    %cst_65 = arith.constant 0.000000e+00 : f32
    %123 = vector.broadcast %cst_65 : f32 to vector<2x128xf32>
    %124 = arith.maximumf %122, %123 : vector<2x128xf32>
    %125 = arith.truncf %124 : vector<2x128xf32> to vector<2x128xbf16>
    %c2_66 = arith.constant 2 : index
    %c0_67 = arith.constant 0 : index
    %c0_68 = arith.constant 0 : index
    %126 = vector.load %arg10[%c2_66, %c0_67, %c0_68] : memref<4x128x64xbf16, #tpu.memory_space<vmem>>, vector<1x128x64xbf16>
    %127 = vector.shape_cast %126 : vector<1x128x64xbf16> to vector<128x64xbf16>
    %cst_69 = arith.constant dense<0.000000e+00> : vector<2x64xf32>
    %128 = tpu.matmul %125, %127, %cst_69 {dimension_numbers = #tpu.dot_dimension_numbers<[1], [0], [0], [1], [0, 0, 1, 1], [], []>} : vector<2x128xbf16>, vector<128x64xbf16>, vector<2x64xf32> -> vector<2x64xf32>
    %129 = arith.index_cast %97 : i32 to index
    %c0_70 = arith.constant 0 : index
    %130 = vector.load %arg5[%129, %c0_70] : memref<8x64xf32, #tpu.memory_space<vmem>>, vector<1x64xf32>
    %131 = vector.broadcast %130 : vector<1x64xf32> to vector<2x64xf32>
    %132 = arith.addf %128, %131 : vector<2x64xf32>
    %cst_71 = arith.constant 0.000000e+00 : f32
    %133 = vector.broadcast %cst_71 : f32 to vector<2x64xf32>
    %134 = arith.maximumf %132, %133 : vector<2x64xf32>
    %135 = arith.truncf %134 : vector<2x64xf32> to vector<2x64xbf16>
    %c2_72 = arith.constant 2 : index
    %c0_73 = arith.constant 0 : index
    %c0_74 = arith.constant 0 : index
    %136 = vector.load %arg11[%c2_72, %c0_73, %c0_74] : memref<4x64x1xbf16, #tpu.memory_space<vmem>>, vector<1x64x1xbf16>
    %137 = vector.shape_cast %136 : vector<1x64x1xbf16> to vector<64x1xbf16>
    %cst_75 = arith.constant dense<0.000000e+00> : vector<2x1xf32>
    %138 = tpu.matmul %135, %137, %cst_75 {dimension_numbers = #tpu.dot_dimension_numbers<[1], [0], [0], [1], [0, 0, 1, 1], [], []>} : vector<2x64xbf16>, vector<64x1xbf16>, vector<2x1xf32> -> vector<2x1xf32>
    %139 = arith.index_cast %97 : i32 to index
    %c0_76 = arith.constant 0 : index
    %140 = vector.load %arg6[%139, %c0_76] : memref<8x1xf32, #tpu.memory_space<vmem>>, vector<1x1xf32>
    %141 = vector.broadcast %140 : vector<1x1xf32> to vector<2x1xf32>
    %142 = arith.addf %138, %141 : vector<2x1xf32>
    %c3_i32 = arith.constant 3 : i32
    %143 = arith.addi %0, %c3_i32 : i32
    %144 = vector.extract_strided_slice %4 {offsets = [0, 384], sizes = [2, 128], strides = [1, 1]} : vector<2x512xf32> to vector<2x128xf32>
    %145 = arith.index_cast %143 : i32 to index
    %c0_77 = arith.constant 0 : index
    %146 = vector.load %arg2[%145, %c0_77] : memref<8x128xf32, #tpu.memory_space<vmem>>, vector<1x128xf32>
    %147 = vector.broadcast %146 : vector<1x128xf32> to vector<2x128xf32>
    %148 = arith.addf %144, %147 : vector<2x128xf32>
    %cst_78 = arith.constant 0.000000e+00 : f32
    %149 = vector.broadcast %cst_78 : f32 to vector<2x128xf32>
    %150 = arith.maximumf %148, %149 : vector<2x128xf32>
    %151 = arith.truncf %150 : vector<2x128xf32> to vector<2x128xbf16>
    %c3 = arith.constant 3 : index
    %c0_79 = arith.constant 0 : index
    %c0_80 = arith.constant 0 : index
    %152 = vector.load %arg8[%c3, %c0_79, %c0_80] : memref<4x128x128xbf16, #tpu.memory_space<vmem>>, vector<1x128x128xbf16>
    %153 = vector.shape_cast %152 : vector<1x128x128xbf16> to vector<128x128xbf16>
    %cst_81 = arith.constant dense<0.000000e+00> : vector<2x128xf32>
    %154 = tpu.matmul %151, %153, %cst_81 {dimension_numbers = #tpu.dot_dimension_numbers<[1], [0], [0], [1], [0, 0, 1, 1], [], []>} : vector<2x128xbf16>, vector<128x128xbf16>, vector<2x128xf32> -> vector<2x128xf32>
    %155 = arith.index_cast %143 : i32 to index
    %c0_82 = arith.constant 0 : index
    %156 = vector.load %arg3[%155, %c0_82] : memref<8x128xf32, #tpu.memory_space<vmem>>, vector<1x128xf32>
    %157 = vector.broadcast %156 : vector<1x128xf32> to vector<2x128xf32>
    %158 = arith.addf %154, %157 : vector<2x128xf32>
    %cst_83 = arith.constant 0.000000e+00 : f32
    %159 = vector.broadcast %cst_83 : f32 to vector<2x128xf32>
    %160 = arith.maximumf %158, %159 : vector<2x128xf32>
    %161 = arith.truncf %160 : vector<2x128xf32> to vector<2x128xbf16>
    %c3_84 = arith.constant 3 : index
    %c0_85 = arith.constant 0 : index
    %c0_86 = arith.constant 0 : index
    %162 = vector.load %arg9[%c3_84, %c0_85, %c0_86] : memref<4x128x128xbf16, #tpu.memory_space<vmem>>, vector<1x128x128xbf16>
    %163 = vector.shape_cast %162 : vector<1x128x128xbf16> to vector<128x128xbf16>
    %cst_87 = arith.constant dense<0.000000e+00> : vector<2x128xf32>
    %164 = tpu.matmul %161, %163, %cst_87 {dimension_numbers = #tpu.dot_dimension_numbers<[1], [0], [0], [1], [0, 0, 1, 1], [], []>} : vector<2x128xbf16>, vector<128x128xbf16>, vector<2x128xf32> -> vector<2x128xf32>
    %165 = arith.index_cast %143 : i32 to index
    %c0_88 = arith.constant 0 : index
    %166 = vector.load %arg4[%165, %c0_88] : memref<8x128xf32, #tpu.memory_space<vmem>>, vector<1x128xf32>
    %167 = vector.broadcast %166 : vector<1x128xf32> to vector<2x128xf32>
    %168 = arith.addf %164, %167 : vector<2x128xf32>
    %cst_89 = arith.constant 0.000000e+00 : f32
    %169 = vector.broadcast %cst_89 : f32 to vector<2x128xf32>
    %170 = arith.maximumf %168, %169 : vector<2x128xf32>
    %171 = arith.truncf %170 : vector<2x128xf32> to vector<2x128xbf16>
    %c3_90 = arith.constant 3 : index
    %c0_91 = arith.constant 0 : index
    %c0_92 = arith.constant 0 : index
    %172 = vector.load %arg10[%c3_90, %c0_91, %c0_92] : memref<4x128x64xbf16, #tpu.memory_space<vmem>>, vector<1x128x64xbf16>
    %173 = vector.shape_cast %172 : vector<1x128x64xbf16> to vector<128x64xbf16>
    %cst_93 = arith.constant dense<0.000000e+00> : vector<2x64xf32>
    %174 = tpu.matmul %171, %173, %cst_93 {dimension_numbers = #tpu.dot_dimension_numbers<[1], [0], [0], [1], [0, 0, 1, 1], [], []>} : vector<2x128xbf16>, vector<128x64xbf16>, vector<2x64xf32> -> vector<2x64xf32>
    %175 = arith.index_cast %143 : i32 to index
    %c0_94 = arith.constant 0 : index
    %176 = vector.load %arg5[%175, %c0_94] : memref<8x64xf32, #tpu.memory_space<vmem>>, vector<1x64xf32>
    %177 = vector.broadcast %176 : vector<1x64xf32> to vector<2x64xf32>
    %178 = arith.addf %174, %177 : vector<2x64xf32>
    %cst_95 = arith.constant 0.000000e+00 : f32
    %179 = vector.broadcast %cst_95 : f32 to vector<2x64xf32>
    %180 = arith.maximumf %178, %179 : vector<2x64xf32>
    %181 = arith.truncf %180 : vector<2x64xf32> to vector<2x64xbf16>
    %c3_96 = arith.constant 3 : index
    %c0_97 = arith.constant 0 : index
    %c0_98 = arith.constant 0 : index
    %182 = vector.load %arg11[%c3_96, %c0_97, %c0_98] : memref<4x64x1xbf16, #tpu.memory_space<vmem>>, vector<1x64x1xbf16>
    %183 = vector.shape_cast %182 : vector<1x64x1xbf16> to vector<64x1xbf16>
    %cst_99 = arith.constant dense<0.000000e+00> : vector<2x1xf32>
    %184 = tpu.matmul %181, %183, %cst_99 {dimension_numbers = #tpu.dot_dimension_numbers<[1], [0], [0], [1], [0, 0, 1, 1], [], []>} : vector<2x64xbf16>, vector<64x1xbf16>, vector<2x1xf32> -> vector<2x1xf32>
    %185 = arith.index_cast %143 : i32 to index
    %c0_100 = arith.constant 0 : index
    %186 = vector.load %arg6[%185, %c0_100] : memref<8x1xf32, #tpu.memory_space<vmem>>, vector<1x1xf32>
    %187 = vector.broadcast %186 : vector<1x1xf32> to vector<2x1xf32>
    %188 = arith.addf %184, %187 : vector<2x1xf32>
    %189 = tpu.concatenate %50, %96, %142, %188 in 1 : vector<2x1xf32>, vector<2x1xf32>, vector<2x1xf32>, vector<2x1xf32> -> vector<2x4xf32>
    %c0_101 = arith.constant 0 : index
    %c0_102 = arith.constant 0 : index
    %c0_103 = arith.constant 0 : index
    %190 = vector.load %arg12[%c0_101, %c0_102, %c0_103] : memref<1x2x4xf32, #tpu.memory_space<vmem>>, vector<1x2x4xf32>
    %191 = vector.shape_cast %190 : vector<1x2x4xf32> to vector<2x4xf32>
    %192 = vector.shape_cast %189 : vector<2x4xf32> to vector<1x2x4xf32>
    tpu.vector_store %arg12[%c0_101, %c0_102, %c0_103], %192 {strides = array<i32>} : memref<1x2x4xf32, #tpu.memory_space<vmem>>, vector<1x2x4xf32>,
    return
  }
  func.func @transform_0(%arg0: i32) -> (i32, i32) {
    %c0_i32 = arith.constant 0 : i32
    %c0_i32_0 = arith.constant 0 : i32
    %c0_i32_1 = arith.constant 0 : i32
    return %c0_i32, %c0_i32_0 : i32, i32
  }
  func.func @transform_1(%arg0: i32) -> (i32, i32) {
    %c0_i32 = arith.constant 0 : i32
    %c0_i32_0 = arith.constant 0 : i32
    %c0_i32_1 = arith.constant 0 : i32
    return %c0_i32, %c0_i32_0 : i32, i32
  }
  func.func @transform_2(%arg0: i32) -> (i32, i32) {
    %c0_i32 = arith.constant 0 : i32
    %c0_i32_0 = arith.constant 0 : i32
    %c0_i32_1 = arith.constant 0 : i32
    return %c0_i32, %c0_i32_0 : i32, i32
  }
  func.func @transform_3(%arg0: i32) -> (i32, i32) {
    %c0_i32 = arith.constant 0 : i32
    %c0_i32_0 = arith.constant 0 : i32
    %c0_i32_1 = arith.constant 0 : i32
    return %c0_i32, %c0_i32_0 : i32, i32
  }
  func.func @transform_4(%arg0: i32) -> (i32, i32) {
    %c0_i32 = arith.constant 0 : i32
    %c0_i32_0 = arith.constant 0 : i32
    %c0_i32_1 = arith.constant 0 : i32
    return %c0_i32, %c0_i32_0 : i32, i32
  }
  func.func @transform_5(%arg0: i32) -> (i32, i32) {
    %c0_i32 = arith.constant 0 : i32
    %c0_i32_0 = arith.constant 0 : i32
    %c0_i32_1 = arith.constant 0 : i32
    return %c0_i32, %c0_i32_0 : i32, i32
  }
  func.func @transform_6(%arg0: i32) -> (i32, i32, i32) {
    %c0_i32 = arith.constant 0 : i32
    %c0_i32_0 = arith.constant 0 : i32
    %c0_i32_1 = arith.constant 0 : i32
    return %arg0, %c0_i32, %c0_i32_0 : i32, i32, i32
  }
  func.func @transform_7(%arg0: i32) -> (i32, i32, i32) {
    %c0_i32 = arith.constant 0 : i32
    %c0_i32_0 = arith.constant 0 : i32
    %c0_i32_1 = arith.constant 0 : i32
    return %arg0, %c0_i32, %c0_i32_0 : i32, i32, i32
  }
  func.func @transform_8(%arg0: i32) -> (i32, i32, i32) {
    %c0_i32 = arith.constant 0 : i32
    %c0_i32_0 = arith.constant 0 : i32
    %c0_i32_1 = arith.constant 0 : i32
    return %arg0, %c0_i32, %c0_i32_0 : i32, i32, i32
  }
  func.func @transform_9(%arg0: i32) -> (i32, i32, i32) {
    %c0_i32 = arith.constant 0 : i32
    %c0_i32_0 = arith.constant 0 : i32
    %c0_i32_1 = arith.constant 0 : i32
    return %arg0, %c0_i32, %c0_i32_0 : i32, i32, i32
  }
  func.func @transform_10(%arg0: i32) -> (i32, i32, i32) {
    %c0_i32 = arith.constant 0 : i32
    %c0_i32_0 = arith.constant 0 : i32
    %c0_i32_1 = arith.constant 0 : i32
    return %arg0, %c0_i32, %c0_i32_0 : i32, i32, i32
  }
  func.func @transform_11(%arg0: i32) -> (i32, i32, i32) {
    %c0_i32 = arith.constant 0 : i32
    %c0_i32_0 = arith.constant 0 : i32
    %c0_i32_1 = arith.constant 0 : i32
    return %arg0, %c0_i32, %c0_i32_0 : i32, i32, i32
  }
}

</mosaic_0001>

<bundles_post_ra>
// kernel: batched_fcn_forward.1
= control target key start
LH: loop header
LB: loop body
LE: loop exit
PB: predicated region body
PF: predicated region fallthrough
CT: control target
= control target key end

     0   :  { %s5235_s0 = inlined_call_operand.vmem [shape: bf16[2,512], index: 0, kind: input, shape index: {}]   ;;  %s5236_s1 = inlined_call_operand.vmem [shape: f32[8,128], index: 1, kind: input, shape index: {}]   ;;  %s5237_s2 = inlined_call_operand.vmem [shape: f32[8,128], index: 2, kind: input, shape index: {}]   ;;  %s5238_s3 = inlined_call_operand.vmem [shape: f32[8,128], index: 3, kind: input, shape index: {}]   ;;  %s5239_s4 = inlined_call_operand.vmem [shape: f32[8,64], index: 4, kind: input, shape index: {}]   ;;  %s5240_s5 = inlined_call_operand.vmem [shape: f32[8,1], index: 5, kind: input, shape index: {}]   ;;  %s5241_s6 = inlined_call_operand.hbm [shape: bf16[2,512,512], index: 6, kind: input, shape index: {}]   ;;  %s5242_s7 = inlined_call_operand.vmem [shape: bf16[8,128,128], index: 7, kind: input, shape index: {}]   ;;  %s5243_s8 = inlined_call_operand.hbm [shape: bf16[8,128,128], index: 8, kind: input, shape index: {}]   ;;  %s5244_s9 = inlined_call_operand.vmem [shape: bf16[8,128,64], index: 9, kind: input, shape index: {}]   ;;  %s5245_s10 = inlined_call_operand.vmem [shape: bf16[8,64,1], index: 10, kind: input, shape index: {}]   ;;  %s5246_s11 = inlined_call_operand.vmem [shape: f32[2,2,4], index: 11, kind: output, shape index: {}]  }
   0x1   :  { %5250 = sst [smem:[#allocation11_spill]] %s5241_s6 }
   0x2   :  { %5251 = sst [smem:[#allocation12_spill]] %s5246_s11 }
   0x3   :  { %16 = vsyncpa [#allocation3], 0 }
   0x4   :  { %18 = vsyncpa [#allocation3 + $0x1], 0 }
   0x5   :  { %19 = vsyncpa [#allocation5], 0 }
   0x6   :  { %21 = vsyncpa [#allocation5 + $0x1], 0  ;;  %s4614_s17 = smov 0   ;;  %s4616_s18 = smov 0  }
   0x7   :  { %s4618_s19 = smov 0   ;;  %s4620_s20 = smov 0  }
   0x8 LB: > { %5252 = sst [smem:[#allocation8_spill]] %s4541_s19  ;;  %s4633_s21 = sadd.s32 4294967295, %s4545_s20   ;;  %s4545_s20 = sphi %s4620_s20, %s5261_s20   ;;  %s4541_s19 = sphi %s4618_s19, %s5263_s19   ;;  %s4537_s18 = sphi %s4616_s18, %s5265_s18   ;;  %s4533_s17 = sphi %s4614_s17, %s5264_s17  }
   0x9   : > { %s4636_s22 = sadd.s32 1, %s4545_s20   ;;  %s160_s24 = sadd.s32 1, %s4541_s19 }
   0xa   : > { %5253 = sst [smem:[#allocation9_spill]] %s4636_s22  ;;  %s157_s23 = ssub.s32 %s4545_s20, %s4636_s22 }
   0xb   : > { %p158_p0 = scmp.eq.s32.totalorder %s157_s23, 0  ;;  %p167_p1 = scmp.ne.s32.totalorder %s4541_s19, %s4537_s18 }
   0xc   : > { %p168_p2 = scmp.eq.s32.totalorder %s4545_s20, 0  ;;  %p173_p3 = scmp.ne.s32.totalorder %s4537_s18, %s4533_s17 }
   0xd   : > { %s4646_s25 = scalar_select %p158_p0, %s4541_s19, %s160_s24  }
   0xe   : > { %p4648_p4 = por %p168_p2, %p167_p1  ;;  %p174_p5 = scmp.eq.s32.totalorder %s4633_s21, 0 }
   0xf   : > { %5254 = sst [smem:[#allocation10_spill]] %s4646_s25  ;;  %p4387_p6 = scmp.lt.s32.totalorder %s4545_s20, 2 }
  0x10   : > { %p4654_p7 = por %p174_p5, %p173_p3  ;;  %s4659_s28 = sand.u32 1, %s4541_s19  }
  0x11   : > { %s2945_s29 = sshll.u32 %s4659_s28, 10  ;;  %s4130_s30 = sshll.u32 %s4545_s20, 10 }
  0x12   : > { %s5257_s6 = sld [smem:[#allocation11_spill]]  ;;  %s349_s15 = scalar_lea.vmem [#allocation2], %s2945_s29 }
  0x13   : > { %s357_s16 = sshll.u32 %s349_s15, 4  ;;  %p4668_p8 = pnand %p4387_p6, %p4648_p4  ;;  %s358_s16 = int_to_ptr.vmem [resolvable:$true] %s357_s16 }
  0x14   : > { %p2952_p9 = scmp.ge.s32.totalorder %s4545_s20, 1  ;;  %s346_s24 = scalar_lea.sflag [#allocation3], %s4659_s28 }
  0x15   : > { %p4451_p11 = pneg %p4668_p8 }
  0x18   : > { %s354_s14 = scalar_lea.hbm %s5257_s6, %s4130_s30  ;;  %s4454_s30 = scalar_lea.hbm %s5257_s6, 2048 }
  0x19   : > { %s355_s17 = sshll.u32 %s354_s14, 4  ;;  %s356_s17 = int_to_ptr.hbm [resolvable:$true] %s355_s17 }
  0x1a   : > { %s4447_s25 = sshra.s32 %s356_s17, 4  ;;  %s4448_s25 = int_to_ptr.hbm [resolvable:$true] %s4447_s25 }
  0x1b   : > { %s4449_s19 = scalar_lea.hbm %s4448_s25, 1024  ;;  %p4455_p0 = scmp.lt.s32.totalorder %s4448_s25, %s5257_s6 }
  0x1c   : > { %p4450_p10 = scmp.ne.s32.totalorder %s4448_s25, %s4449_s19  ;;  %p4456_p1 = scmp.lt.s32.totalorder %s4454_s30, %s4449_s19 }
  0x1e   : > { %p4452_p12 = pnand %p4451_p11, %p4450_p10  ;;  %p4457_p2 = por %p4456_p1, %p4455_p0 }
  0x20   : > { %p4453_p13 = pneg %p4452_p12 }
  0x22   : > { %p4458_p3 = pnand %p4457_p2, %p4453_p13 }
  0x24   : > { %4461 = shalt.err (!%p4458_p3)
}
  0x25   : > { %s4547_s14 = smov 256   ;;  %s4548_s15 = smov 16  }
  0x26   : > { %4383 = dma.hbm_to_vmem [thread:$0]  (!%p4668_p8), %s356_s17, 16384, %s358_s16, %s346_s24, %s4547_s14, %s4547_s14, %s4548_s15  }
  0x27   : > { %p418_p4 = scmp.lt.s32.totalorder %s4545_s20, 3  ;;  %s2948_s29 = sshll.u32 %s4659_s28, 8 }
  0x28   : > { %s4132_s26 = sshll.u32 %s4545_s20, 8  ;;  %s381_s13 = scalar_lea.vmem [#allocation4], %s2948_s29 }
  0x29   : > { %p4692_p5 = pnand %p2952_p9, %p418_p4  ;;  %s387_s12 = scalar_lea.hbm %s5243_s8, %s4132_s26 }
  0x2a   : > { %s390_s6 = sshll.u32 %s381_s13, 4  ;;  %s388_s22 = sshll.u32 %s387_s12, 4  ;;  %s391_s6 = int_to_ptr.vmem [resolvable:$true] %s390_s6  ;;  %s389_s22 = int_to_ptr.hbm [resolvable:$true] %s388_s22 }
  0x2b   : > { %s378_s11 = scalar_lea.sflag [#allocation5], %s4659_s28  ;;  %s4477_s16 = sshra.s32 %s389_s22, 4  ;;  %s4478_s16 = int_to_ptr.hbm [resolvable:$true] %s4477_s16 }
  0x2c   : > { %s4479_s17 = scalar_lea.hbm %s4478_s16, 256  ;;  %s4484_s14 = scalar_lea.hbm %s5243_s8, 512 }
  0x2d   : > { %p4480_p6 = scmp.ne.s32.totalorder %s4478_s16, %s4479_s17  ;;  %p4485_p12 = scmp.lt.s32.totalorder %s4478_s16, %s5243_s8 }
  0x2e   : > { %p4486_p13 = scmp.lt.s32.totalorder %s4484_s14, %s4479_s17 }
  0x2f   : > { %p4482_p9 = pnand %p4480_p6, %p4451_p11 }
  0x30   : > { %p4487_p0 = por %p4486_p13, %p4485_p12 }
  0x31   : > { %p4483_p10 = pneg %p4482_p9 }
  0x33   : > { %p4488_p1 = pnand %p4487_p0, %p4483_p10 }
  0x35   : > { %4491 = shalt.err (!%p4488_p1)
}
  0x36   : > { %s4549_s28 = smov 64   ;;  %s4550_s29 = smov 4  }
  0x37   : > { %4386 = dma.hbm_to_vmem [thread:$0]  (!%p4668_p8), %s389_s22, 4096, %s391_s6, %s378_s11, %s4549_s28, %s4549_s28, %s4550_s29  }
  0x38   : > { %422 = sbr.rel (%p4692_p5) target bundleno = 2156 (0x86c), region = 64  ;;  %s424_s25 = sand.u32 (!%p4692_p5), 1, %s4537_s18  }
  0x39   : > { %s2953_s30 = sshll.u32 (!%p4692_p5), %s424_s25, 10  ;;  %s425_s12 = scalar_lea.sflag (!%p4692_p5), [#allocation3], %s424_s25 }
  0x3a   : > { %s4714_s13 = scalar_lea.vmem (!%p4692_p5), [#allocation2], %s2953_s30 }
  0x3d   : > { %4524 = dma.done.wait (%p4654_p7), %s425_s12, 16384  }
  0x3e   : > { %4526 = vsyncadd (%p4654_p7), %s425_s12, 4294950912  ;;  %s2954_s16 = sshll.u32 %s424_s25, 8  ;;  %s435_s17 = scalar_lea.sflag [#allocation5], %s424_s25 }
  0x3f   : > { %s4720_s23 = scalar_lea.vmem [#allocation4], %s2954_s16 }
  0x40   : > { %4528 = dma.done.wait (%p4654_p7), %s435_s17, 4096  }
  0x41   : > { %4530 = vsyncadd (%p4654_p7), %s435_s17, 4294963200  ;;  %v3080_v0 = vld [vmem:[%s4714_s13 + $0xe0] sm:$0xf]  ;;  %v4166_v1 = vld [vmem:[%s4714_s13 + $0xec] sm:$0xf0]  ;;  %s4891_s22 = sshll.u32 %s4633_s21, 2 }
  0x42   : > { %v3208_v2 = vld [vmem:[%s4714_s13 + $0x1e0] sm:$0xf]  ;;  %v3081_v3 = vor.u32 %v4166_v1, %v3080_v0  ;;  %v4198_v4 = vld [vmem:[%s4714_s13 + $0x1ec] sm:$0xf0]  ;;  %s4898_s20 = scalar_lea.vmem %s5236_s1, %s4891_s22  ;;  %p501_p7 = scmp.lt.s32.totalorder %s4891_s22, 7  ;;  %vm1802_vm0 = vcmask 523264  }
  0x43   : > { %v3336_v5 = vld [vmem:[%s4714_s13 + $0x2e0] sm:$0xf]  ;;  %v4230_v6 = vld [vmem:[%s4714_s13 + $0x2ec] sm:$0xf0]  ;;  %v3209_v7 = vor.u32 %v4198_v4, %v3208_v2  ;;  %s5042_s30 = scalar_lea.vmem %s5237_s2, %s4891_s22  ;;  %s5051_s16 = scalar_lea.vmem %s5238_s3, %s4891_s22  ;;  %vm2755_vm1 = vcmask 7168   ;;  %vm2757_vm2 = vcmask 15360  }
  0x44   : > { %v3337_v8 = vor.u32 %v4230_v6, %v3336_v5  ;;  %v3464_v9 = vld [vmem:[%s4714_s13 + $0x3e0] sm:$0xf]  ;;  %v4262_v10 = vld [vmem:[%s4714_s13 + $0x3ec] sm:$0xf0]  ;;  %1307 = vmatpush.bf16.msra.mxu0 %v3081_v3  ;;  %s4998_s24 = scalar_select %p501_p7, %s4891_s22, 7  ;;  %vm2759_vm3 = vcmask 23552  }
  0x45   : > { %v3064_v11 = vld [vmem:[%s4714_s13 + $0xc0] sm:$0xf]  ;;  %v3465_v12 = vor.u32 %v4262_v10, %v3464_v9  ;;  %v4162_v13 = vld [vmem:[%s4714_s13 + $0xcc] sm:$0xf0]  ;;  %1320 = vmatpush.bf16.msra.mxu1 %v3209_v7  ;;  %p522_p8 = scmp.lt.s32.totalorder %s4633_s21, 1  ;;  %s5260_s17 = sld [smem:[#allocation12_spill]] }
  0x46   : > { %v3192_v14 = vld [vmem:[%s4714_s13 + $0x1c0] sm:$0xf]  ;;  %v4194_v15 = vld [vmem:[%s4714_s13 + $0x1cc] sm:$0xf0]  ;;  %1333 = vmatpush.bf16.msra.mxu2 %v3337_v8  ;;  %v3065_v16 = vor.u32 %v4162_v13, %v3064_v11  ;;  %s4133_s14 = sshll.u32 %s4998_s24, 6  ;;  %s4135_s15 = sshll.u32 %s4998_s24, 5 }
  0x47   : > { %v3193_v17 = vor.u32 %v4194_v15, %v3192_v14  ;;  %v3320_v18 = vld [vmem:[%s4714_s13 + $0x2c0] sm:$0xf]  ;;  %v4226_v19 = vld [vmem:[%s4714_s13 + $0x2cc] sm:$0xf0]  ;;  %1346 = vmatpush.bf16.msra.mxu3 %v3465_v12  ;;  %v528_v14 = vld [vmem:[%s5235_s0] sm:$0xf]  ;;  %s5020_s28 = scalar_lea.vmem %s5242_s7, %s4133_s14  ;;  %s5072_s11 = scalar_lea.vmem %s5244_s9, %s4133_s14 }
  0x48   : > { %v3448_v20 = vld [vmem:[%s4714_s13 + $0x3c0] sm:$0xf]  ;;  %v3321_v21 = vor.u32 %v4226_v19, %v3320_v18  ;;  %v4258_v22 = vld [vmem:[%s4714_s13 + $0x3cc] sm:$0xf0]  ;;  %1308 = vmatpush.bf16.msra.mxu0 %v3065_v16  ;;  %658 = vst [vmem:[#allocation1] ss:$9 sm:$0xff] %v528_v14  ;;  %s5085_s14 = scalar_lea.vmem %s5239_s4, %s4891_s22  ;;  %s5093_s25 = scalar_lea.vmem %s5245_s10, %s4135_s15 }
  0x49   : > { %v3048_v23 = vld [vmem:[%s4714_s13 + $0xa0] sm:$0xf]  ;;  %v4158_v24 = vld [vmem:[%s4714_s13 + $0xac] sm:$0xf0]  ;;  %v3449_v25 = vor.u32 %v4258_v22, %v3448_v20  ;;  %1321 = vmatpush.bf16.msra.mxu1 %v3193_v17  ;;  %s5267_s21 = smov (!%p522_p8, %s4633_s21), 1  ;;  %vm2761_vm4 = vcmask 25600  }
  0x4a   : > { %v3176_v26 = vld [vmem:[%s4714_s13 + $0x1a0] sm:$0xf]  ;;  %v4190_v27 = vld [vmem:[%s4714_s13 + $0x1ac] sm:$0xf0]  ;;  %v3049_v29 = vor.u32 %v4158_v24, %v3048_v23  ;;  %1334 = vmatpush.bf16.msra.mxu2 %v3321_v21 }
  0x4b   : > { %v3304_v28 = vld [vmem:[%s4714_s13 + $0x2a0] sm:$0xf]  ;;  %v4222_v30 = vld [vmem:[%s4714_s13 + $0x2ac] sm:$0xf0]  ;;  %v3177_v33 = vor.u32 %v4190_v27, %v3176_v26  ;;  %1347 = vmatpush.bf16.msra.mxu3 %v3449_v25 }
  0x4c   : > { %v3432_v31 = vld [vmem:[%s4714_s13 + $0x3a0] sm:$0xf]  ;;  %v4254_v32 = vld [vmem:[%s4714_s13 + $0x3ac] sm:$0xf0]  ;;  %v3305_v34 = vor.u32 %v4222_v30, %v3304_v28  ;;  %1309 = vmatpush.bf16.msra.mxu0 %v3049_v29  ;;  %v4164_v29 = vld [vmem:[%s4714_s13 + $0xe4] sm:$0xf] }
  0x4d   : > { %v3032_v35 = vld [vmem:[%s4714_s13 + $0x80] sm:$0xf]  ;;  %v4154_v36 = vld [vmem:[%s4714_s13 + $0x8c] sm:$0xf0]  ;;  %v3433_v38 = vor.u32 %v4254_v32, %v3432_v31  ;;  %1322 = vmatpush.bf16.msra.mxu1 %v3177_v33  ;;  %v3082_v30 = vld [vmem:[%s4714_s13 + $0xf0] sm:$0xf0] }
  0x4e   : > { %v3160_v37 = vld [vmem:[%s4714_s13 + $0x180] sm:$0xf]  ;;  %v4186_v39 = vld [vmem:[%s4714_s13 + $0x18c] sm:$0xf0]  ;;  %v3033_v44 = vor.u32 %v4154_v36, %v3032_v35  ;;  %1335 = vmatpush.bf16.msra.mxu2 %v3305_v34  ;;  %v4228_v32 = vld [vmem:[%s4714_s13 + $0x2e4] sm:$0xf] }
  0x4f   : > { %v3288_v40 = vld [vmem:[%s4714_s13 + $0x280] sm:$0xf]  ;;  %v4218_v41 = vld [vmem:[%s4714_s13 + $0x28c] sm:$0xf0]  ;;  %v3161_v45 = vor.u32 %v4186_v39, %v3160_v37  ;;  %1348 = vmatpush.bf16.msra.mxu3 %v3433_v38  ;;  %v3338_v33 = vld [vmem:[%s4714_s13 + $0x2f0] sm:$0xf0]  ;;  %v3085_v37 = vor.u32 %v4164_v29, %v3082_v30 }
  0x50   : > { %v3416_v42 = vld [vmem:[%s4714_s13 + $0x380] sm:$0xf]  ;;  %v4250_v43 = vld [vmem:[%s4714_s13 + $0x38c] sm:$0xf0]  ;;  %v3289_v46 = vor.u32 %v4218_v41, %v3288_v40  ;;  %1310 = vmatpush.bf16.msra.mxu0 %v3033_v44  ;;  %v4160_v38 = vld [vmem:[%s4714_s13 + $0xc4] sm:$0xf] }
  0x51   : > { %v3016_v47 = vld [vmem:[%s4714_s13 + $0x60] sm:$0xf]  ;;  %v4150_v48 = vld [vmem:[%s4714_s13 + $0x6c] sm:$0xf0]  ;;  %v3417_v50 = vor.u32 %v4250_v43, %v3416_v42  ;;  %1323 = vmatpush.bf16.msra.mxu1 %v3161_v45  ;;  %v4196_v39 = vld [vmem:[%s4714_s13 + $0x1e4] sm:$0xf]  ;;  %v3341_v42 = vor.u32 %v4228_v32, %v3338_v33 }
  0x52   : > { %v3144_v49 = vld [vmem:[%s4714_s13 + $0x160] sm:$0xf]  ;;  %v4182_v51 = vld [vmem:[%s4714_s13 + $0x16c] sm:$0xf0]  ;;  %v3017_v56 = vor.u32 %v4150_v48, %v3016_v47  ;;  %1336 = vmatpush.bf16.msra.mxu2 %v3289_v46  ;;  %v3210_v40 = vld [vmem:[%s4714_s13 + $0x1f0] sm:$0xf0] }
  0x53   : > { %v3272_v52 = vld [vmem:[%s4714_s13 + $0x260] sm:$0xf]  ;;  %v4214_v53 = vld [vmem:[%s4714_s13 + $0x26c] sm:$0xf0]  ;;  %v3145_v57 = vor.u32 %v4182_v51, %v3144_v49  ;;  %1349 = vmatpush.bf16.msra.mxu3 %v3417_v50  ;;  %v3066_v41 = vld [vmem:[%s4714_s13 + $0xd0] sm:$0xf0]  ;;  %v3213_v51 = vor.u32 %v4196_v39, %v3210_v40 }
  0x54   : > { %v3400_v54 = vld [vmem:[%s4714_s13 + $0x360] sm:$0xf]  ;;  %v4246_v55 = vld [vmem:[%s4714_s13 + $0x36c] sm:$0xf0]  ;;  %v3273_v58 = vor.u32 %v4214_v53, %v3272_v52  ;;  %1311 = vmatpush.bf16.msra.mxu0 %v3017_v56  ;;  %v4260_v43 = vld [vmem:[%s4714_s13 + $0x3e4] sm:$0xf]  ;;  %v3069_v53 = vor.u32 %v4160_v38, %v3066_v41 }
  0x55   : > { %v3000_v59 = vld [vmem:[%s4714_s13 + $0x40] sm:$0xf]  ;;  %v4146_v60 = vld [vmem:[%s4714_s13 + $0x4c] sm:$0xf0]  ;;  %v3401_v62 = vor.u32 %v4246_v55, %v3400_v54  ;;  %1324 = vmatpush.bf16.msra.mxu1 %v3145_v57  ;;  %v3466_v44 = vld [vmem:[%s4714_s13 + $0x3f0] sm:$0xf0] }
  0x56   : > { %v3128_v61 = vld [vmem:[%s4714_s13 + $0x140] sm:$0xf]  ;;  %v4178_v63 = vld [vmem:[%s4714_s13 + $0x14c] sm:$0xf0]  ;;  %v3001_v4 = vor.u32 %v4146_v60, %v3000_v59  ;;  %1337 = vmatpush.bf16.msra.mxu2 %v3273_v58  ;;  %v4803_v45 = vld [vmem:[#allocation1] sm:$0xff]  ;;  %v3469_v54 = vor.u32 %v4260_v43, %v3466_v44 }
  0x57   : > { %v3256_v0 = vld [vmem:[%s4714_s13 + $0x240] sm:$0xf]  ;;  %v4210_v1 = vld [vmem:[%s4714_s13 + $0x24c] sm:$0xf0]  ;;  %v3129_v6 = vor.u32 %v4178_v63, %v3128_v61  ;;  %1350 = vmatpush.bf16.msra.mxu3 %v3401_v62  ;;  %v4224_v46 = vld [vmem:[%s4714_s13 + $0x2c4] sm:$0xf] }
  0x58   : > { %v3384_v2 = vld [vmem:[%s4714_s13 + $0x340] sm:$0xf]  ;;  %v4242_v3 = vld [vmem:[%s4714_s13 + $0x34c] sm:$0xf0]  ;;  %v3257_v7 = vor.u32 %v4210_v1, %v3256_v0  ;;  %1312 = vmatpush.bf16.msra.mxu0 %v3001_v4  ;;  %v3322_v47 = vld [vmem:[%s4714_s13 + $0x2d0] sm:$0xf0] }
  0x59   : > { %v2984_v5 = vld [vmem:[%s4714_s13 + $0x20] sm:$0xf]  ;;  %v4142_v8 = vld [vmem:[%s4714_s13 + $0x2c] sm:$0xf0]  ;;  %v3385_v11 = vor.u32 %v4242_v3, %v3384_v2  ;;  %1325 = vmatpush.bf16.msra.mxu1 %v3129_v6  ;;  %v4156_v50 = vld [vmem:[%s4714_s13 + $0xa4] sm:$0xf]  ;;  %v3325_v58 = vor.u32 %v4224_v46, %v3322_v47 }
  0x5a   : > { %v3112_v9 = vld [vmem:[%s4714_s13 + $0x120] sm:$0xf]  ;;  %v4174_v10 = vld [vmem:[%s4714_s13 + $0x12c] sm:$0xf0]  ;;  %v2985_v17 = vor.u32 %v4142_v8, %v2984_v5  ;;  %1338 = vmatpush.bf16.msra.mxu2 %v3257_v7  ;;  %v4192_v55 = vld [vmem:[%s4714_s13 + $0x1c4] sm:$0xf] }
  0x5b   : > { %v3240_v12 = vld [vmem:[%s4714_s13 + $0x220] sm:$0xf]  ;;  %v4206_v13 = vld [vmem:[%s4714_s13 + $0x22c] sm:$0xf0]  ;;  %v3113_v19 = vor.u32 %v4174_v10, %v3112_v9  ;;  %1351 = vmatpush.bf16.msra.mxu3 %v3385_v11  ;;  %v3194_v56 = vld [vmem:[%s4714_s13 + $0x1d0] sm:$0xf0] }
  0x5c   : > { %v3368_v15 = vld [vmem:[%s4714_s13 + $0x320] sm:$0xf]  ;;  %v4238_v16 = vld [vmem:[%s4714_s13 + $0x32c] sm:$0xf0]  ;;  %v3241_v20 = vor.u32 %v4206_v13, %v3240_v12  ;;  %1313 = vmatpush.bf16.msra.mxu0 %v2985_v17  ;;  %v3050_v57 = vld [vmem:[%s4714_s13 + $0xb0] sm:$0xf0]  ;;  %v3197_v63 = vor.u32 %v4192_v55, %v3194_v56 }
  0x5d   : > { %v2968_v18 = vld [vmem:[%s4714_s13] sm:$0xf]  ;;  %v4138_v21 = vld [vmem:[%s4714_s13 + $0xc] sm:$0xf0]  ;;  %v3369_v24 = vor.u32 %v4238_v16, %v3368_v15  ;;  %1326 = vmatpush.bf16.msra.mxu1 %v3113_v19  ;;  %v4256_v59 = vld [vmem:[%s4714_s13 + $0x3c4] sm:$0xf]  ;;  %v3053_v0 = vor.u32 %v4156_v50, %v3050_v57 }
  0x5e   : > { %v3096_v22 = vld [vmem:[%s4714_s13 + $0x100] sm:$0xf]  ;;  %v4170_v23 = vld [vmem:[%s4714_s13 + $0x10c] sm:$0xf0]  ;;  %v2969_v31 = vor.u32 %v4138_v21, %v2968_v18  ;;  %1339 = vmatpush.bf16.msra.mxu2 %v3241_v20  ;;  %v3450_v60 = vld [vmem:[%s4714_s13 + $0x3d0] sm:$0xf0] }
  0x5f   : > { %v3224_v25 = vld [vmem:[%s4714_s13 + $0x200] sm:$0xf]  ;;  %v4202_v26 = vld [vmem:[%s4714_s13 + $0x20c] sm:$0xf0]  ;;  %v3097_v34 = vor.u32 %v4170_v23, %v3096_v22  ;;  %1352 = vmatpush.bf16.msra.mxu3 %v3369_v24  ;;  %v4220_v61 = vld [vmem:[%s4714_s13 + $0x2a4] sm:$0xf]  ;;  %v3453_v2 = vor.u32 %v4256_v59, %v3450_v60 }
  0x60   : > { %v3352_v27 = vld [vmem:[%s4714_s13 + $0x300] sm:$0xf]  ;;  %v4234_v28 = vld [vmem:[%s4714_s13 + $0x30c] sm:$0xf0]  ;;  %v3225_v35 = vor.u32 %v4202_v26, %v3224_v25  ;;  %1314 = vmatpush.bf16.msra.mxu0 %v2969_v31  ;;  %v3306_v62 = vld [vmem:[%s4714_s13 + $0x2b0] sm:$0xf0] }
  0x61   : > { %v3353_v36 = vor.u32 %v4234_v28, %v3352_v27  ;;  %1327 = vmatpush.bf16.msra.mxu1 %v3097_v34  ;;  %v4807_v48 = vld [vmem:[#allocation1 + $0x9] sm:$0xff]  ;;  %v4809_v49 = vld [vmem:[#allocation1 + $0x12] sm:$0xff]  ;;  %v4812_v52 = vld [vmem:[#allocation1 + $0x1b] sm:$0xff]  ;;  %v3309_v6 = vor.u32 %v4220_v61, %v3306_v62 }
  0x62   : > { %1340 = vmatpush.bf16.msra.mxu2 %v3225_v35  ;;  %v4152_v1 = vld [vmem:[%s4714_s13 + $0x84] sm:$0xf]  ;;  %v3178_v4 = vld [vmem:[%s4714_s13 + $0x1b0] sm:$0xf0]  ;;  %v4167_v62 = vld [vmem:[%s4714_s13 + $0xf4] sm:$0xf0] }
  0x63   : > { %1353 = vmatpush.bf16.msra.mxu3 %v3353_v36  ;;  %1315 = vmatmul.bf16.vlgmr.msra.gmra.mxu0 %v4803_v45  ;;  %v4188_v3 = vld [vmem:[%s4714_s13 + $0x1a4] sm:$0xf]  ;;  %v3034_v5 = vld [vmem:[%s4714_s13 + $0x90] sm:$0xf0] }
  0x64   : > { %1359 = vmatpush.bf16.msrb.mxu0 %v3085_v37  ;;  %1328 = vmatmul.bf16.vlgmr.msra.gmra.mxu1 %v4807_v48  ;;  %v4252_v7 = vld [vmem:[%s4714_s13 + $0x3a4] sm:$0xf]  ;;  %v3434_v8 = vld [vmem:[%s4714_s13 + $0x3b0] sm:$0xf0]  ;;  %v3181_v11 = vor.u32 %v4188_v3, %v3178_v4  ;;  %v3037_v12 = vor.u32 %v4152_v1, %v3034_v5  ;;  %v4231_v3 = vld [vmem:[%s4714_s13 + $0x2f4] sm:$0xf0] }
  0x65   : > { %1341 = vmatmul.bf16.vlgmr.msra.gmra.mxu2 %v4809_v49  ;;  %1372 = vmatpush.bf16.msrb.mxu1 %v3213_v51  ;;  %v4216_v9 = vld [vmem:[%s4714_s13 + $0x284] sm:$0xf]  ;;  %v3290_v10 = vld [vmem:[%s4714_s13 + $0x290] sm:$0xf0]  ;;  %v3437_v14 = vor.u32 %v4252_v7, %v3434_v8  ;;  %v3072_v5 = vld [vmem:[%s4714_s13 + $0xc8] sm:$0xf] }
  0x66   : > { %1385 = vmatpush.bf16.msrb.mxu2 %v3341_v42  ;;  %1354 = vmatmul.bf16.vlgmr.msra.gmra.mxu3 %v4812_v52  ;;  %v4148_v13 = vld [vmem:[%s4714_s13 + $0x64] sm:$0xf]  ;;  %v3162_v16 = vld [vmem:[%s4714_s13 + $0x190] sm:$0xf0]  ;;  %v3293_v18 = vor.u32 %v4216_v9, %v3290_v10 }
  0x67   : > { %1398 = vmatpush.bf16.msrb.mxu3 %v3469_v54  ;;  %v4184_v15 = vld [vmem:[%s4714_s13 + $0x184] sm:$0xf]  ;;  %v3018_v17 = vld [vmem:[%s4714_s13 + $0x70] sm:$0xf0] }
  0x68   : > { %1360 = vmatpush.bf16.msrb.mxu0 %v3069_v53  ;;  %v4248_v19 = vld [vmem:[%s4714_s13 + $0x384] sm:$0xf]  ;;  %v3418_v20 = vld [vmem:[%s4714_s13 + $0x390] sm:$0xf0]  ;;  %v3165_v23 = vor.u32 %v4184_v15, %v3162_v16  ;;  %v3021_v24 = vor.u32 %v4148_v13, %v3018_v17  ;;  %v3216_v13 = vld [vmem:[%s4714_s13 + $0x1e8] sm:$0xf] }
  0x69   : > { %1373 = vmatpush.bf16.msrb.mxu1 %v3197_v63  ;;  %v4212_v21 = vld [vmem:[%s4714_s13 + $0x264] sm:$0xf]  ;;  %v3274_v22 = vld [vmem:[%s4714_s13 + $0x270] sm:$0xf0]  ;;  %v3421_v26 = vor.u32 %v4248_v19, %v3418_v20  ;;  %v4163_v15 = vld [vmem:[%s4714_s13 + $0xd4] sm:$0xf0] }
  0x6a   : > { %1386 = vmatpush.bf16.msrb.mxu2 %v3325_v58  ;;  %v4144_v25 = vld [vmem:[%s4714_s13 + $0x44] sm:$0xf]  ;;  %v3146_v28 = vld [vmem:[%s4714_s13 + $0x170] sm:$0xf0]  ;;  %v3277_v30 = vor.u32 %v4212_v21, %v3274_v22  ;;  %v3088_v58 = vld [vmem:[%s4714_s13 + $0xe8] sm:$0xf] }
  0x6b   : > { %1399 = vmatpush.bf16.msrb.mxu3 %v3453_v2  ;;  %v4180_v27 = vld [vmem:[%s4714_s13 + $0x164] sm:$0xf]  ;;  %v3002_v29 = vld [vmem:[%s4714_s13 + $0x50] sm:$0xf0]  ;;  %v3344_v2 = vld [vmem:[%s4714_s13 + $0x2e8] sm:$0xf]  ;;  %v3089_v10 = vor.u32 %v4167_v62, %v3088_v58 }
  0x6c   : > { %1361 = vmatpush.bf16.msrb.mxu0 %v3053_v0  ;;  %v4244_v31 = vld [vmem:[%s4714_s13 + $0x364] sm:$0xf]  ;;  %v3402_v32 = vld [vmem:[%s4714_s13 + $0x370] sm:$0xf0]  ;;  %v3149_v35 = vor.u32 %v4180_v27, %v3146_v28  ;;  %v3005_v36 = vor.u32 %v4144_v25, %v3002_v29  ;;  %v3345_v16 = vor.u32 %v4231_v3, %v3344_v2  ;;  %v3472_v17 = vld [vmem:[%s4714_s13 + $0x3e8] sm:$0xf] }
  0x6d   : > { %1374 = vmatpush.bf16.msrb.mxu1 %v3181_v11  ;;  %v4208_v33 = vld [vmem:[%s4714_s13 + $0x244] sm:$0xf]  ;;  %v3258_v34 = vld [vmem:[%s4714_s13 + $0x250] sm:$0xf0]  ;;  %v3405_v38 = vor.u32 %v4244_v31, %v3402_v32  ;;  %v3328_v20 = vld [vmem:[%s4714_s13 + $0x2c8] sm:$0xf] }
  0x6e   : > { %1387 = vmatpush.bf16.msrb.mxu2 %v3309_v6  ;;  %v4140_v37 = vld [vmem:[%s4714_s13 + $0x24] sm:$0xf]  ;;  %v3130_v40 = vld [vmem:[%s4714_s13 + $0x150] sm:$0xf0]  ;;  %v3261_v42 = vor.u32 %v4208_v33, %v3258_v34  ;;  %v4227_v21 = vld [vmem:[%s4714_s13 + $0x2d4] sm:$0xf0] }
  0x6f   : > { %1400 = vmatpush.bf16.msrb.mxu3 %v3437_v14  ;;  %v4176_v39 = vld [vmem:[%s4714_s13 + $0x144] sm:$0xf]  ;;  %v2986_v41 = vld [vmem:[%s4714_s13 + $0x30] sm:$0xf0]  ;;  %v4199_v14 = vld [vmem:[%s4714_s13 + $0x1f4] sm:$0xf0] }
  0x70   : > { %1362 = vmatpush.bf16.msrb.mxu0 %v3037_v12  ;;  %v4240_v43 = vld [vmem:[%s4714_s13 + $0x344] sm:$0xf]  ;;  %v3386_v44 = vld [vmem:[%s4714_s13 + $0x350] sm:$0xf0]  ;;  %v3133_v51 = vor.u32 %v4176_v39, %v3130_v40  ;;  %v2989_v53 = vor.u32 %v4140_v37, %v2986_v41  ;;  %v3056_v25 = vld [vmem:[%s4714_s13 + $0xa8] sm:$0xf] }
  0x71   : > { %1375 = vmatpush.bf16.msrb.mxu1 %v3165_v23  ;;  %v4204_v46 = vld [vmem:[%s4714_s13 + $0x224] sm:$0xf]  ;;  %v3242_v47 = vld [vmem:[%s4714_s13 + $0x230] sm:$0xf0]  ;;  %v3389_v55 = vor.u32 %v4240_v43, %v3386_v44  ;;  %v3217_v23 = vor.u32 %v4199_v14, %v3216_v13  ;;  %v3200_v27 = vld [vmem:[%s4714_s13 + $0x1c8] sm:$0xf] }
  0x72   : > { %1388 = vmatpush.bf16.msrb.mxu2 %v3293_v18  ;;  %v4136_v50 = vld [vmem:[%s4714_s13 + $0x4] sm:$0xf]  ;;  %v2970_v54 = vld [vmem:[%s4714_s13 + $0x10] sm:$0xf0]  ;;  %v3245_v59 = vor.u32 %v4204_v46, %v3242_v47  ;;  %v4263_v18 = vld [vmem:[%s4714_s13 + $0x3f4] sm:$0xf0] }
  0x73   : > { %1401 = vmatpush.bf16.msrb.mxu3 %v3421_v26  ;;  %v4172_v56 = vld [vmem:[%s4714_s13 + $0x124] sm:$0xf]  ;;  %v3114_v57 = vld [vmem:[%s4714_s13 + $0x130] sm:$0xf0]  ;;  %v2973_v4 = vor.u32 %v4136_v50, %v2970_v54  ;;  %v3473_v26 = vor.u32 %v4263_v18, %v3472_v17  ;;  %v4195_v28 = vld [vmem:[%s4714_s13 + $0x1d4] sm:$0xf0] }
  0x74   : > { %1363 = vmatpush.bf16.msrb.mxu0 %v3021_v24  ;;  %v4236_v60 = vld [vmem:[%s4714_s13 + $0x324] sm:$0xf]  ;;  %v3370_v61 = vld [vmem:[%s4714_s13 + $0x330] sm:$0xf0]  ;;  %v3117_v1 = vor.u32 %v4172_v56, %v3114_v57  ;;  %v3073_v24 = vor.u32 %v4163_v15, %v3072_v5  ;;  %v4159_v29 = vld [vmem:[%s4714_s13 + $0xb4] sm:$0xf0] }
  0x75   : > { %1376 = vmatpush.bf16.msrb.mxu1 %v3149_v35  ;;  %v4200_v63 = vld [vmem:[%s4714_s13 + $0x204] sm:$0xf]  ;;  %v3226_v0 = vld [vmem:[%s4714_s13 + $0x210] sm:$0xf0]  ;;  %v3373_v6 = vor.u32 %v4236_v60, %v3370_v61  ;;  %v3456_v31 = vld [vmem:[%s4714_s13 + $0x3c8] sm:$0xf]  ;;  %v3057_v37 = vor.u32 %v4159_v29, %v3056_v25 }
  0x76   : > { %1389 = vmatpush.bf16.msrb.mxu2 %v3277_v30  ;;  %v4232_v7 = vld [vmem:[%s4714_s13 + $0x304] sm:$0xf]  ;;  %v3098_v9 = vld [vmem:[%s4714_s13 + $0x110] sm:$0xf0]  ;;  %v3229_v11 = vor.u32 %v4200_v63, %v3226_v0  ;;  %v3329_v30 = vor.u32 %v4227_v21, %v3328_v20  ;;  %v4259_v32 = vld [vmem:[%s4714_s13 + $0x3d4] sm:$0xf0] }
  0x77   : > { %1402 = vmatpush.bf16.msrb.mxu3 %v3405_v38  ;;  %v4168_v8 = vld [vmem:[%s4714_s13 + $0x104] sm:$0xf]  ;;  %v3354_v12 = vld [vmem:[%s4714_s13 + $0x310] sm:$0xf0]  ;;  %v3312_v33 = vld [vmem:[%s4714_s13 + $0x2a8] sm:$0xf]  ;;  %v3457_v38 = vor.u32 %v4259_v32, %v3456_v31 }
  0x78   : > { %1364 = vmatpush.bf16.msrb.mxu0 %v3005_v36  ;;  %v3101_v19 = vor.u32 %v4168_v8, %v3098_v9  ;;  %v3357_v22 = vor.u32 %v4232_v7, %v3354_v12  ;;  %v4223_v34 = vld [vmem:[%s4714_s13 + $0x2b4] sm:$0xf0]  ;;  %v3040_v35 = vld [vmem:[%s4714_s13 + $0x88] sm:$0xf]  ;;  %v3201_v36 = vor.u32 %v4195_v28, %v3200_v27 }
  0x79   : > { %1377 = vmatpush.bf16.msrb.mxu1 %v3133_v51  ;;  %v3184_v39 = vld [vmem:[%s4714_s13 + $0x1a8] sm:$0xf]  ;;  %v4191_v40 = vld [vmem:[%s4714_s13 + $0x1b4] sm:$0xf0] }
  0x7a   : > { %1390 = vmatpush.bf16.msrb.mxu2 %v3261_v42  ;;  %v4155_v41 = vld [vmem:[%s4714_s13 + $0x94] sm:$0xf0]  ;;  %v3313_v42 = vor.u32 %v4223_v34, %v3312_v33  ;;  %v3440_v43 = vld [vmem:[%s4714_s13 + $0x3a8] sm:$0xf]  ;;  %v3185_v51 = vor.u32 %v4191_v40, %v3184_v39  ;;  %v3090_v34 = vld [vmem:[%s4714_s13 + $0xf8] sm:$0xf0] }
  0x7b   : > { %1403 = vmatpush.bf16.msrb.mxu3 %v3389_v55  ;;  %v4255_v44 = vld [vmem:[%s4714_s13 + $0x3b4] sm:$0xf0]  ;;  %v3296_v46 = vld [vmem:[%s4714_s13 + $0x288] sm:$0xf]  ;;  %v3041_v54 = vor.u32 %v4155_v41, %v3040_v35  ;;  %v3346_v39 = vld [vmem:[%s4714_s13 + $0x2f8] sm:$0xf0] }
  0x7c   : > { %1365 = vmatpush.bf16.msrb.mxu0 %v2989_v53  ;;  %v4219_v47 = vld [vmem:[%s4714_s13 + $0x294] sm:$0xf0]  ;;  %v3024_v50 = vld [vmem:[%s4714_s13 + $0x68] sm:$0xf]  ;;  %v3441_v55 = vor.u32 %v4255_v44, %v3440_v43  ;;  %v4161_v41 = vld [vmem:[%s4714_s13 + $0xcc] sm:$0xf] }
  0x7d   : > { %1378 = vmatpush.bf16.msrb.mxu1 %v3117_v1  ;;  %v3168_v53 = vld [vmem:[%s4714_s13 + $0x188] sm:$0xf]  ;;  %v4187_v56 = vld [vmem:[%s4714_s13 + $0x194] sm:$0xf0]  ;;  %v3297_v58 = vor.u32 %v4219_v47, %v3296_v46 }
  0x7e   : > { %1391 = vmatpush.bf16.msrb.mxu2 %v3245_v59  ;;  %v4151_v57 = vld [vmem:[%s4714_s13 + $0x74] sm:$0xf0]  ;;  %v3424_v59 = vld [vmem:[%s4714_s13 + $0x388] sm:$0xf]  ;;  %v3169_v63 = vor.u32 %v4187_v56, %v3168_v53  ;;  %v4197_v53 = vld [vmem:[%s4714_s13 + $0x1ec] sm:$0xf] }
  0x7f   : > { %1404 = vmatpush.bf16.msrb.mxu3 %v3373_v6  ;;  %v4251_v60 = vld [vmem:[%s4714_s13 + $0x394] sm:$0xf0]  ;;  %v3280_v61 = vld [vmem:[%s4714_s13 + $0x268] sm:$0xf]  ;;  %v3025_v0 = vor.u32 %v4151_v57, %v3024_v50  ;;  %v4261_v57 = vld [vmem:[%s4714_s13 + $0x3ec] sm:$0xf] }
  0x80   : > { %1366 = vmatpush.bf16.msrb.mxu0 %v2973_v4  ;;  %v4215_v62 = vld [vmem:[%s4714_s13 + $0x274] sm:$0xf0]  ;;  %v3008_v1 = vld [vmem:[%s4714_s13 + $0x48] sm:$0xf]  ;;  %v3425_v2 = vor.u32 %v4251_v60, %v3424_v59  ;;  %v4225_v60 = vld [vmem:[%s4714_s13 + $0x2cc] sm:$0xf] }
  0x81   : > { %1379 = vmatpush.bf16.msrb.mxu1 %v3101_v19  ;;  %v3152_v3 = vld [vmem:[%s4714_s13 + $0x168] sm:$0xf]  ;;  %v4183_v4 = vld [vmem:[%s4714_s13 + $0x174] sm:$0xf0]  ;;  %v3281_v6 = vor.u32 %v4215_v62, %v3280_v61  ;;  %v3330_v61 = vld [vmem:[%s4714_s13 + $0x2d8] sm:$0xf0] }
  0x82   : > { %1392 = vmatpush.bf16.msrb.mxu2 %v3229_v11  ;;  %v4147_v5 = vld [vmem:[%s4714_s13 + $0x54] sm:$0xf0]  ;;  %v3408_v7 = vld [vmem:[%s4714_s13 + $0x368] sm:$0xf]  ;;  %v3153_v11 = vor.u32 %v4183_v4, %v3152_v3  ;;  %v4193_v3 = vld [vmem:[%s4714_s13 + $0x1cc] sm:$0xf] }
  0x83   : > { %1367 = vmatmul.bf16.vlgmr.msrb.gmra.mxu0 %v4803_v45  ;;  %1405 = vmatpush.bf16.msrb.mxu3 %v3357_v22  ;;  %v4247_v8 = vld [vmem:[%s4714_s13 + $0x374] sm:$0xf0]  ;;  %v3264_v9 = vld [vmem:[%s4714_s13 + $0x248] sm:$0xf]  ;;  %v3009_v12 = vor.u32 %v4147_v5, %v3008_v1  ;;  %v4157_v1 = vld [vmem:[%s4714_s13 + $0xac] sm:$0xf] }
  0x84   : > { %1411 = vmatpush.bf16.msra.mxu0 %v3089_v10  ;;  %1380 = vmatmul.bf16.vlgmr.msrb.gmra.mxu1 %v4807_v48  ;;  %v4211_v10 = vld [vmem:[%s4714_s13 + $0x254] sm:$0xf0]  ;;  %v2992_v13 = vld [vmem:[%s4714_s13 + $0x28] sm:$0xf]  ;;  %v3409_v14 = vor.u32 %v4247_v8, %v3408_v7  ;;  %v3202_v4 = vld [vmem:[%s4714_s13 + $0x1d8] sm:$0xf0] }
  0x85   : > { %1424 = vmatpush.bf16.msra.mxu1 %v3217_v23  ;;  %1393 = vmatmul.bf16.vlgmr.msrb.gmra.mxu2 %v4809_v49  ;;  %v3136_v15 = vld [vmem:[%s4714_s13 + $0x148] sm:$0xf]  ;;  %v4143_v17 = vld [vmem:[%s4714_s13 + $0x34] sm:$0xf0]  ;;  %v3265_v18 = vor.u32 %v4211_v10, %v3264_v9  ;;  %v3058_v5 = vld [vmem:[%s4714_s13 + $0xb8] sm:$0xf0] }
  0x86   : > { %1437 = vmatpush.bf16.msra.mxu2 %v3345_v16  ;;  %1406 = vmatmul.bf16.vlgmr.msrb.gmra.mxu3 %v4812_v52  ;;  %v4179_v16 = vld [vmem:[%s4714_s13 + $0x154] sm:$0xf0]  ;;  %v3392_v19 = vld [vmem:[%s4714_s13 + $0x348] sm:$0xf]  ;;  %v2993_v25 = vor.u32 %v4143_v17, %v2992_v13  ;;  %v4257_v7 = vld [vmem:[%s4714_s13 + $0x3cc] sm:$0xf] }
  0x87   : > { %1450 = vmatpush.bf16.msra.mxu3 %v3473_v26  ;;  %v4243_v20 = vld [vmem:[%s4714_s13 + $0x354] sm:$0xf0]  ;;  %v3248_v21 = vld [vmem:[%s4714_s13 + $0x228] sm:$0xf]  ;;  %v3458_v8 = vld [vmem:[%s4714_s13 + $0x3d8] sm:$0xf0] }
  0x88   : > { %1412 = vmatpush.bf16.msra.mxu0 %v3073_v24  ;;  %v4207_v22 = vld [vmem:[%s4714_s13 + $0x234] sm:$0xf0]  ;;  %v2976_v23 = vld [vmem:[%s4714_s13 + $0x8] sm:$0xf]  ;;  %v3137_v24 = vor.u32 %v4179_v16, %v3136_v15  ;;  %v3393_v27 = vor.u32 %v4243_v20, %v3392_v19  ;;  %v4221_v9 = vld [vmem:[%s4714_s13 + $0x2ac] sm:$0xf] }
  0x89   : > { %1425 = vmatpush.bf16.msra.mxu1 %v3201_v36  ;;  %v4139_v26 = vld [vmem:[%s4714_s13 + $0x14] sm:$0xf0]  ;;  %v3120_v28 = vld [vmem:[%s4714_s13 + $0x128] sm:$0xf]  ;;  %v3249_v31 = vor.u32 %v4207_v22, %v3248_v21  ;;  %v3314_v10 = vld [vmem:[%s4714_s13 + $0x2b8] sm:$0xf0] }
  0x8a   : > { %1438 = vmatpush.bf16.msra.mxu2 %v3329_v30  ;;  %v4175_v29 = vld [vmem:[%s4714_s13 + $0x134] sm:$0xf0]  ;;  %v4165_v30 = vld [vmem:[%s4714_s13 + $0xec] sm:$0xf]  ;;  %v3376_v32 = vld [vmem:[%s4714_s13 + $0x328] sm:$0xf]  ;;  %v2977_v40 = vor.u32 %v4139_v26, %v2976_v23 }
  0x8b   : > { %1451 = vmatpush.bf16.msra.mxu3 %v3457_v38  ;;  %v4239_v33 = vld [vmem:[%s4714_s13 + $0x334] sm:$0xf0]  ;;  %v3232_v35 = vld [vmem:[%s4714_s13 + $0x208] sm:$0xf]  ;;  %v4229_v38 = vld [vmem:[%s4714_s13 + $0x2ec] sm:$0xf]  ;;  %v3093_v47 = vor.u32 %v4165_v30, %v3090_v34 }
  0x8c   : > { %1413 = vmatpush.bf16.msra.mxu0 %v3057_v37  ;;  %v4203_v36 = vld [vmem:[%s4714_s13 + $0x214] sm:$0xf0]  ;;  %v3121_v37 = vor.u32 %v4175_v29, %v3120_v28  ;;  %v3360_v43 = vld [vmem:[%s4714_s13 + $0x308] sm:$0xf]  ;;  %v3349_v56 = vor.u32 %v4229_v38, %v3346_v39  ;;  %v4153_v13 = vld [vmem:[%s4714_s13 + $0x8c] sm:$0xf] }
  0x8d   : > { %1426 = vmatpush.bf16.msra.mxu1 %v3185_v51  ;;  %v3104_v44 = vld [vmem:[%s4714_s13 + $0x108] sm:$0xf]  ;;  %v4171_v46 = vld [vmem:[%s4714_s13 + $0x114] sm:$0xf0]  ;;  %v3233_v50 = vor.u32 %v4203_v36, %v3232_v35  ;;  %v4189_v15 = vld [vmem:[%s4714_s13 + $0x1ac] sm:$0xf] }
  0x8e   : > { %1439 = vmatpush.bf16.msra.mxu2 %v3313_v42  ;;  %v3377_v42 = vor.u32 %v4239_v33, %v3376_v32  ;;  %v4235_v51 = vld [vmem:[%s4714_s13 + $0x314] sm:$0xf0]  ;;  %v3105_v59 = vor.u32 %v4171_v46, %v3104_v44  ;;  %v3186_v16 = vld [vmem:[%s4714_s13 + $0x1b8] sm:$0xf0]  ;;  %v4253_v19 = vld [vmem:[%s4714_s13 + $0x3ac] sm:$0xf] }
  0x8f   : > { %1452 = vmatpush.bf16.msra.mxu3 %v3441_v55  ;;  %v3074_v55 = vld [vmem:[%s4714_s13 + $0xd8] sm:$0xf0]  ;;  %v3361_v62 = vor.u32 %v4235_v51, %v3360_v43  ;;  %v4217_v21 = vld [vmem:[%s4714_s13 + $0x28c] sm:$0xf]  ;;  %v3189_v23 = vor.u32 %v4189_v15, %v3186_v16  ;;  %v4271_v16 = vld [vmem:[%s5020_s28 + $0x38] sm:$0xff] }
  0x90   : > { %1414 = vmatpush.bf16.msra.mxu0 %v3041_v54  ;;  %v3218_v54 = vld [vmem:[%s4714_s13 + $0x1f8] sm:$0xf0]  ;;  %v4213_v33 = vld [vmem:[%s4714_s13 + $0x26c] sm:$0xf] }
  0x91   : > { %1427 = vmatpush.bf16.msra.mxu1 %v3169_v63  ;;  %v3221_v63 = vor.u32 %v4197_v53, %v3218_v54  ;;  %v3042_v17 = vld [vmem:[%s4714_s13 + $0x98] sm:$0xf0]  ;;  %v4181_v39 = vld [vmem:[%s4714_s13 + $0x16c] sm:$0xf] }
  0x92   : > { %1440 = vmatpush.bf16.msra.mxu2 %v3297_v58  ;;  %v3474_v58 = vld [vmem:[%s4714_s13 + $0x3f8] sm:$0xf0]  ;;  %v4245_v43 = vld [vmem:[%s4714_s13 + $0x36c] sm:$0xf] }
  0x93   : > { %1453 = vmatpush.bf16.msra.mxu3 %v3425_v2  ;;  %v3477_v2 = vor.u32 %v4261_v57, %v3474_v58  ;;  %v3442_v20 = vld [vmem:[%s4714_s13 + $0x3b8] sm:$0xf0]  ;;  %v4209_v46 = vld [vmem:[%s4714_s13 + $0x24c] sm:$0xf] }
  0x94   : > { %1415 = vmatpush.bf16.msra.mxu0 %v3025_v0  ;;  %v3077_v0 = vor.u32 %v4161_v41, %v3074_v55  ;;  %v3298_v22 = vld [vmem:[%s4714_s13 + $0x298] sm:$0xf0]  ;;  %v3445_v26 = vor.u32 %v4253_v19, %v3442_v20  ;;  %v4141_v53 = vld [vmem:[%s4714_s13 + $0x2c] sm:$0xf] }
  0x95   : > { %1428 = vmatpush.bf16.msra.mxu1 %v3153_v11  ;;  %v3205_v11 = vor.u32 %v4193_v3, %v3202_v4  ;;  %v3170_v28 = vld [vmem:[%s4714_s13 + $0x198] sm:$0xf0]  ;;  %v3301_v30 = vor.u32 %v4217_v21, %v3298_v22  ;;  %v4177_v55 = vld [vmem:[%s4714_s13 + $0x14c] sm:$0xf] }
  0x96   : > { %1441 = vmatpush.bf16.msra.mxu2 %v3281_v6  ;;  %v3333_v6 = vor.u32 %v4225_v60, %v3330_v61  ;;  %v3026_v29 = vld [vmem:[%s4714_s13 + $0x78] sm:$0xf0]  ;;  %v4205_v61 = vld [vmem:[%s4714_s13 + $0x22c] sm:$0xf] }
  0x97   : > { %1454 = vmatpush.bf16.msra.mxu3 %v3409_v14  ;;  %v3461_v14 = vor.u32 %v4257_v7, %v3458_v8  ;;  %v3426_v32 = vld [vmem:[%s4714_s13 + $0x398] sm:$0xf0]  ;;  %v4173_v3 = vld [vmem:[%s4714_s13 + $0x12c] sm:$0xf] }
  0x98   : > { %1416 = vmatpush.bf16.msra.mxu0 %v3009_v12  ;;  %v3061_v12 = vor.u32 %v4157_v1, %v3058_v5  ;;  %v3282_v34 = vld [vmem:[%s4714_s13 + $0x278] sm:$0xf0]  ;;  %v4137_v1 = vld [vmem:[%s4714_s13 + $0xc] sm:$0xf] }
  0x99   : > { %1429 = vmatpush.bf16.msra.mxu1 %v3137_v24  ;;  %v3045_v24 = vor.u32 %v4153_v13, %v3042_v17  ;;  %v3010_v41 = vld [vmem:[%s4714_s13 + $0x58] sm:$0xf0]  ;;  %v4237_v7 = vld [vmem:[%s4714_s13 + $0x32c] sm:$0xf] }
  0x9a   : > { %1442 = vmatpush.bf16.msra.mxu2 %v3265_v18  ;;  %v3317_v18 = vor.u32 %v4221_v9, %v3314_v10  ;;  %v3410_v44 = vld [vmem:[%s4714_s13 + $0x378] sm:$0xf0]  ;;  %v4201_v9 = vld [vmem:[%s4714_s13 + $0x20c] sm:$0xf] }
  0x9b   : > { %1455 = vmatpush.bf16.msra.mxu3 %v3393_v27  ;;  %v4185_v27 = vld [vmem:[%s4714_s13 + $0x18c] sm:$0xf]  ;;  %v3413_v54 = vor.u32 %v4245_v43, %v3410_v44  ;;  %v2994_v57 = vld [vmem:[%s4714_s13 + $0x38] sm:$0xf0] }
  0x9c   : > { %1417 = vmatpush.bf16.msra.mxu0 %v2993_v25  ;;  %v4149_v25 = vld [vmem:[%s4714_s13 + $0x6c] sm:$0xf]  ;;  %v3173_v35 = vor.u32 %v4185_v27, %v3170_v28  ;;  %v3394_v60 = vld [vmem:[%s4714_s13 + $0x358] sm:$0xf0] }
  0x9d   : > { %1430 = vmatpush.bf16.msra.mxu1 %v3121_v37  ;;  %v3029_v36 = vor.u32 %v4149_v25, %v3026_v29  ;;  %v4145_v37 = vld [vmem:[%s4714_s13 + $0x4c] sm:$0xf]  ;;  %v3122_v4 = vld [vmem:[%s4714_s13 + $0x138] sm:$0xf0]  ;;  %v4267_v25 = vld [vmem:[%s5020_s28 + $0x18] sm:$0xff] }
  0x9e   : > { %1443 = vmatpush.bf16.msra.mxu2 %v3249_v31  ;;  %v4249_v31 = vld [vmem:[%s4714_s13 + $0x38c] sm:$0xf]  ;;  %v3013_v51 = vor.u32 %v4145_v37, %v3010_v41  ;;  %v2978_v5 = vld [vmem:[%s4714_s13 + $0x18] sm:$0xf0] }
  0x9f   : > { %1456 = vmatpush.bf16.msra.mxu3 %v3377_v42  ;;  %v3429_v38 = vor.u32 %v4249_v31, %v3426_v32  ;;  %v3285_v42 = vor.u32 %v4213_v33, %v3282_v34  ;;  %v3378_v8 = vld [vmem:[%s4714_s13 + $0x338] sm:$0xf0]  ;;  %v4270_v22 = vld [vmem:[%s5020_s28 + $0x30] sm:$0xff]  ;;  %v4427_v31 = vld [vmem:[%s4898_s20] ss:$0 sm:$0xff] }
  0xa0   : > { %1418 = vmatpush.bf16.msra.mxu0 %v2977_v40  ;;  %v3154_v40 = vld [vmem:[%s4714_s13 + $0x178] sm:$0xf0]  ;;  %v3381_v13 = vor.u32 %v4237_v7, %v3378_v8  ;;  %v4274_v7 = vld [vmem:[%s4720_s23 + $0x10] sm:$0xff] }
  0xa1   : > { %1431 = vmatpush.bf16.msra.mxu1 %v3105_v59  ;;  %v4241_v59 = vld [vmem:[%s4714_s13 + $0x34c] sm:$0xf]  ;;  %v3234_v10 = vld [vmem:[%s4714_s13 + $0x218] sm:$0xf0] }
  0xa2   : > { %1444 = vmatpush.bf16.msra.mxu2 %v3233_v50  ;;  %v3157_v50 = vor.u32 %v4181_v39, %v3154_v40  ;;  %v3106_v15 = vld [vmem:[%s4714_s13 + $0x118] sm:$0xf0]  ;;  %v3237_v17 = vor.u32 %v4201_v9, %v3234_v10 }
  0xa3   : > { %1419 = vmatmul.bf16.vlgmr.msra.gmra.mxu0 %v4803_v45  ;;  %1457 = vmatpush.bf16.msra.mxu3 %v3361_v62  ;;  %v3250_v62 = vld [vmem:[%s4714_s13 + $0x238] sm:$0xf0] }
  0xa4   : > { %1463 = vmatpush.bf16.msrb.mxu0 %v3093_v47  ;;  %1432 = vmatmul.bf16.vlgmr.msra.gmra.mxu1 %v4807_v48  ;;  %v3266_v47 = vld [vmem:[%s4714_s13 + $0x258] sm:$0xf0] }
  0xa5   : > { %1476 = vmatpush.bf16.msrb.mxu1 %v3221_v63  ;;  %1445 = vmatmul.bf16.vlgmr.msra.gmra.mxu2 %v4809_v49  ;;  %v3269_v58 = vor.u32 %v4209_v46, %v3266_v47  ;;  %v3362_v19 = vld [vmem:[%s4714_s13 + $0x318] sm:$0xf0] }
  0xa6   : > { %1489 = vmatpush.bf16.msrb.mxu2 %v3349_v56  ;;  %1458 = vmatmul.bf16.vlgmr.msra.gmra.mxu3 %v4812_v52  ;;  %v3138_v56 = vld [vmem:[%s4714_s13 + $0x158] sm:$0xf0] }
  0xa7   : > { %1502 = vmatpush.bf16.msrb.mxu3 %v3477_v2  ;;  %v3141_v63 = vor.u32 %v4177_v55, %v3138_v56  ;;  %v3397_v2 = vor.u32 %v4241_v59, %v3394_v60  ;;  %v4279_v55 = vld [vmem:[%s4720_s23 + $0x38] sm:$0xff]  ;;  %v4278_v56 = vld [vmem:[%s4720_s23 + $0x30] sm:$0xff]  ;;  %v4277_v60 = vld [vmem:[%s4720_s23 + $0x28] sm:$0xff] }
  0xa8   : > { %1464 = vmatpush.bf16.msrb.mxu0 %v3077_v0  ;;  %v2997_v0 = vor.u32 %v4141_v53, %v2994_v57 }
  0xa9   : > { %1477 = vmatpush.bf16.msrb.mxu1 %v3205_v11  ;;  %v3125_v11 = vor.u32 %v4173_v3, %v3122_v4  ;;  %v4276_v3 = vld [vmem:[%s4720_s23 + $0x20] sm:$0xff]  ;;  %v4275_v4 = vld [vmem:[%s4720_s23 + $0x18] sm:$0xff] }
  0xaa   : > { %1490 = vmatpush.bf16.msrb.mxu2 %v3333_v6  ;;  %v3253_v6 = vor.u32 %v4205_v61, %v3250_v62 }
  0xab   : > { %1503 = vmatpush.bf16.msrb.mxu3 %v3461_v14  ;;  %v4169_v14 = vld [vmem:[%s4714_s13 + $0x10c] sm:$0xf] }
  0xac   : > { %1465 = vmatpush.bf16.msrb.mxu0 %v3061_v12  ;;  %v2981_v12 = vor.u32 %v4137_v1, %v2978_v5  ;;  %v3109_v20 = vor.u32 %v4169_v14, %v3106_v15 }
  0xad   : > { %1478 = vmatpush.bf16.msrb.mxu1 %v3189_v23  ;;  %v4269_v23 = vld [vmem:[%s5020_s28 + $0x28] sm:$0xff] }
  0xae   : > { %1491 = vmatpush.bf16.msrb.mxu2 %v3317_v18  ;;  %v4233_v18 = vld [vmem:[%s4714_s13 + $0x30c] sm:$0xf]  ;;  %s5106_s13 = scalar_lea.vmem %s5240_s5, %s4891_s22  ;;  %s4551_s22 = smov 1  }
  0xaf   : > { %1504 = vmatpush.bf16.msrb.mxu3 %v3445_v26  ;;  %v3365_v21 = vor.u32 %v4233_v18, %v3362_v19  ;;  %v4266_v26 = vld [vmem:[%s5020_s28 + $0x10] sm:$0xff] }
  0xb0   : > { %1466 = vmatpush.bf16.msrb.mxu0 %v3045_v24  ;;  %v4268_v24 = vld [vmem:[%s5020_s28 + $0x20] sm:$0xff]  ;;  %v4273_v19 = vld [vmem:[%s4720_s23 + $0x8] sm:$0xff] }
  0xb1   : > { %1479 = vmatpush.bf16.msrb.mxu1 %v3173_v35 }
  0xb2   : > { %1492 = vmatpush.bf16.msrb.mxu2 %v3301_v30 }
  0xb3   : > { %1505 = vmatpush.bf16.msrb.mxu3 %v3429_v38 }
  0xb4   : > { %1467 = vmatpush.bf16.msrb.mxu0 %v3029_v36 }
  0xb5   : > { %1480 = vmatpush.bf16.msrb.mxu1 %v3157_v50 }
  0xb6   : > { %1493 = vmatpush.bf16.msrb.mxu2 %v3285_v42 }
  0xb7   : > { %1506 = vmatpush.bf16.msrb.mxu3 %v3413_v54 }
  0xb8   : > { %1468 = vmatpush.bf16.msrb.mxu0 %v3013_v51 }
  0xb9   : > { %1481 = vmatpush.bf16.msrb.mxu1 %v3141_v63 }
  0xba   : > { %1494 = vmatpush.bf16.msrb.mxu2 %v3269_v58 }
  0xbb   : > { %1507 = vmatpush.bf16.msrb.mxu3 %v3397_v2 }
  0xbc   : > { %1469 = vmatpush.bf16.msrb.mxu0 %v2997_v0 }
  0xbd   : > { %1482 = vmatpush.bf16.msrb.mxu1 %v3125_v11 }
  0xbe   : > { %1495 = vmatpush.bf16.msrb.mxu2 %v3253_v6 }
  0xbf   : > { %1508 = vmatpush.bf16.msrb.mxu3 %v3381_v13 }
  0xc0   : > { %1470 = vmatpush.bf16.msrb.mxu0 %v2981_v12 }
  0xc1   : > { %1483 = vmatpush.bf16.msrb.mxu1 %v3109_v20  ;;  %v4272_v20 = vld [vmem:[%s4720_s23] sm:$0xff] }
  0xc2   : > { %1496 = vmatpush.bf16.msrb.mxu2 %v3237_v17 }
  0xc3   : > { %1471 = vmatmul.bf16.vlgmr.msrb.gmra.mxu0 %v4803_v45  ;;  %1509 = vmatpush.bf16.msrb.mxu3 %v3365_v21  ;;  %v4265_v45 = vld [vmem:[%s5020_s28 + $0x8] sm:$0xff]  ;;  %v4287_v21 = vld [vmem:[%s5072_s11 + $0x38] sm:$0xff] }
  0xc4   : > { %1588 = vmatpush.bf16.msra.mxu0 %v4271_v16  ;;  %1484 = vmatmul.bf16.vlgmr.msrb.gmra.mxu1 %v4807_v48 }
  0xc5   : > { %1497 = vmatmul.bf16.vlgmr.msrb.gmra.mxu2 %v4809_v49  ;;  %v4264_v49 = vld [vmem:[%s5020_s28] sm:$0xff]  ;;  %1670 = vmatpush.bf16.msra.mxu1 %v4279_v55  ;;  %v4306_v55 = vld [vmem:[%s4720_s23 + $0x70] sm:$0xff] }
  0xc6   : > { %1510 = vmatmul.bf16.vlgmr.msrb.gmra.mxu3 %v4812_v52  ;;  %1752 = vmatpush.bf16.msra.mxu2 %v4287_v21 }
  0xc8   : > { %1589 = vmatpush.bf16.msra.mxu0 %v4270_v22  ;;  %v4286_v22 = vld [vmem:[%s5072_s11 + $0x30] sm:$0xff] }
  0xc9   : > { %1671 = vmatpush.bf16.msra.mxu1 %v4278_v56  ;;  %v4433_v56 = vld [vmem:[%s5085_s14] ss:$0 sm:$0xff] }
  0xca   : > { %1753 = vmatpush.bf16.msra.mxu2 %v4286_v22 }
  0xcc   : > { %1590 = vmatpush.bf16.msra.mxu0 %v4269_v23  ;;  %v4285_v23 = vld [vmem:[%s5072_s11 + $0x28] sm:$0xff] }
  0xcd   : > { %1672 = vmatpush.bf16.msra.mxu1 %v4277_v60 }
  0xce   : > { %1754 = vmatpush.bf16.msra.mxu2 %v4285_v23  ;;  %v4309_v23 = vld [vmem:[%s5072_s11 + $0x48] sm:$0xff] }
  0xd0   : > { %1591 = vmatpush.bf16.msra.mxu0 %v4268_v24  ;;  %v4284_v24 = vld [vmem:[%s5072_s11 + $0x20] sm:$0xff] }
  0xd1   : > { %1673 = vmatpush.bf16.msra.mxu1 %v4276_v3  ;;  %v4305_v3 = vld [vmem:[%s4720_s23 + $0x68] sm:$0xff] }
  0xd2   : > { %1755 = vmatpush.bf16.msra.mxu2 %v4284_v24  ;;  %v4308_v24 = vld [vmem:[%s5072_s11 + $0x40] sm:$0xff] }
  0xd4   : > { %1592 = vmatpush.bf16.msra.mxu0 %v4267_v25  ;;  %v4283_v25 = vld [vmem:[%s5072_s11 + $0x18] sm:$0xff] }
  0xd5   : > { %1674 = vmatpush.bf16.msra.mxu1 %v4275_v4  ;;  %v4304_v4 = vld [vmem:[%s4720_s23 + $0x60] sm:$0xff] }
  0xd6   : > { %1756 = vmatpush.bf16.msra.mxu2 %v4283_v25  ;;  %v4319_v25 = vld [vmem:[%s5093_s25 + $0x38] sm:$0xff] }
  0xd8   : > { %1593 = vmatpush.bf16.msra.mxu0 %v4266_v26  ;;  %v4282_v26 = vld [vmem:[%s5072_s11 + $0x10] sm:$0xff] }
  0xd9   : > { %1675 = vmatpush.bf16.msra.mxu1 %v4274_v7  ;;  %v4301_v7 = vld [vmem:[%s4720_s23 + $0x48] sm:$0xff] }
  0xda   : > { %1757 = vmatpush.bf16.msra.mxu2 %v4282_v26  ;;  %v4318_v26 = vld [vmem:[%s5093_s25 + $0x30] sm:$0xff] }
  0xdc   : > { %1594 = vmatpush.bf16.msra.mxu0 %v4265_v45  ;;  %v4431_v45 = vld [vmem:[%s5042_s30] ss:$0 sm:$0xff] }
  0xdd   : > { %1676 = vmatpush.bf16.msra.mxu1 %v4273_v19 }
  0xe0   : > { %1595 = vmatpush.bf16.msra.mxu0 %v4264_v49  ;;  %v1316_v48 = vpop.f32.mrf.mxu0 }
  0xe1   : > { %v1329_v52 = vpop.f32.mrf.mxu1  ;;  %1677 = vmatpush.bf16.msra.mxu1 %v4272_v20 }
  0xe2   : > { %v1330_v27 = vadd.f32 %v1329_v52, %v1316_v48 }
  0xe8   : > { %v1342_v28 = vpop.f32.mrf.mxu2  ;;  %v1318_v32 = vpop.f32.mrf.mxu0 }
  0xe9   : > { %v1343_v29 = vadd.f32 %v1342_v28, %v1330_v27  ;;  %v1355_v30 = vpop.f32.mrf.mxu3  ;;  %v1331_v33 = vpop.f32.mrf.mxu1  ;;  %v4290_v32 = vld [vmem:[%s5093_s25 + $0x10] sm:$0xff] }
  0xea   : > { %v4289_v33 = vld [vmem:[%s5093_s25 + $0x8] sm:$0xff] }
  0xeb   : > { %v1356_v34 = vadd.f32 %v1355_v30, %v1343_v29  ;;  %v4281_v29 = vld [vmem:[%s5072_s11 + $0x8] sm:$0xff]  ;;  %v4280_v30 = vld [vmem:[%s5072_s11] sm:$0xff] }
  0xec   : > { %1758 = vmatpush.bf16.msra.mxu2 %v4281_v29 }
  0xed   : > { %v1518_v35 = vadd.f32 %v4427_v31, %v1356_v34  ;;  %v4291_v31 = vld [vmem:[%s5093_s25 + $0x18] sm:$0xff]  ;;  %v4288_v34 = vld [vmem:[%s5093_s25] sm:$0xff] }
  0xee   : > { %1810 = vmatpush.bf16.msra.mxu3 %v4291_v31 }
  0xef   : > { %v1519_v36 = vmax.f32 %v1518_v35, 0.0  ;;  %v4299_v35 = vld [vmem:[%s5020_s28 + $0x78] sm:$0xff] }
  0xf0   : > { %v1344_v37 = vpop.f32.mrf.mxu2  ;;  %1759 = vmatpush.bf16.msra.mxu2 %v4280_v30 }
  0xf1   : > { %v1520_v38 = vpack.c.bf16 %v1519_v36, %v1519_v36  ;;  %v1357_v39 = vpop.f32.mrf.mxu3  ;;  %v4298_v36 = vld [vmem:[%s5020_s28 + $0x70] sm:$0xff]  ;;  %v4432_v37 = vld [vmem:[%s5051_s16] ss:$0 sm:$0xff] }
  0xf2   : > { %1811 = vmatpush.bf16.msra.mxu3 %v4290_v32 }
  0xf3   : > { %1596 = vmatmul.bf16.vlgmr.msra.gmra.mxu0 %v1520_v38 }
  0xf4   : > { %2118 = vmatpush.bf16.msrb.mxu2 %v4319_v25 }
  0xf6   : > { %1812 = vmatpush.bf16.msra.mxu3 %v4289_v33  ;;  %v4325_v33 = vld [vmem:[%s5020_s28 + $0xa8] sm:$0xff] }
  0xf8   : > { %2119 = vmatpush.bf16.msrb.mxu2 %v4318_v26 }
  0xfa   : > { %1813 = vmatpush.bf16.msra.mxu3 %v4288_v34  ;;  %v4324_v34 = vld [vmem:[%s5020_s28 + $0xa0] sm:$0xff] }
  0xfe   : > { %1894 = vmatpush.bf16.msrb.mxu3 %v4299_v35  ;;  %v4323_v35 = vld [vmem:[%s5020_s28 + $0x98] sm:$0xff] }
 0x100   : > { %v1368_v40 = vpop.f32.mrf.mxu0 }
 0x101   : > { %v1381_v41 = vpop.f32.mrf.mxu1 }
 0x102   : > { %v1382_v42 = vadd.f32 %v1381_v41, %v1368_v40  ;;  %1895 = vmatpush.bf16.msrb.mxu3 %v4298_v36  ;;  %v4322_v36 = vld [vmem:[%s5020_s28 + $0x90] sm:$0xff] }
 0x108   : > { %v1370_v43 = vpop.f32.mrf.mxu0  ;;  %v1394_v44 = vpop.f32.mrf.mxu2 }
 0x109   : > { %v1407_v46 = vpop.f32.mrf.mxu3  ;;  %v1395_v47 = vadd.f32 %v1394_v44, %v1382_v42  ;;  %v1383_v50 = vpop.f32.mrf.mxu1  ;;  %v4297_v43 = vld [vmem:[%s5020_s28 + $0x68] sm:$0xff]  ;;  %v4296_v44 = vld [vmem:[%s5020_s28 + $0x60] sm:$0xff] }
 0x10a   : > { %1896 = vmatpush.bf16.msrb.mxu3 %v4297_v43  ;;  %v4293_v50 = vld [vmem:[%s5020_s28 + $0x48] sm:$0xff] }
 0x10b   : > { %v5053_v51 = vadd.f32 %v1407_v46, %v1395_v47  ;;  %v4295_v46 = vld [vmem:[%s5020_s28 + $0x58] sm:$0xff]  ;;  %v4294_v47 = vld [vmem:[%s5020_s28 + $0x50] sm:$0xff] }
 0x10e   : > { %1897 = vmatpush.bf16.msrb.mxu3 %v4296_v44 }
 0x110   : > { %v1396_v53 = vpop.f32.mrf.mxu2 }
 0x111   : > { %v1409_v54 = vpop.f32.mrf.mxu3  ;;  %v4292_v53 = vld [vmem:[%s5020_s28 + $0x40] sm:$0xff] }
 0x112   : > { %1898 = vmatpush.bf16.msrb.mxu3 %v4295_v46  ;;  %v4307_v54 = vld [vmem:[%s4720_s23 + $0x78] sm:$0xff] }
 0x113   : > { %1977 = vmatpush.bf16.msrb.mxu0 %v4307_v54 }
 0x116   : > { %1899 = vmatpush.bf16.msrb.mxu3 %v4294_v47 }
 0x117   : > { %1978 = vmatpush.bf16.msrb.mxu0 %v4306_v55 }
 0x11a   : > { %1900 = vmatpush.bf16.msrb.mxu3 %v4293_v50  ;;  %v4429_v50 = vld [vmem:[%s4898_s20 + $0x2] ss:$0 sm:$0xff] }
 0x11b   : > { %1979 = vmatpush.bf16.msrb.mxu0 %v4305_v3 }
 0x11e   : > { %1901 = vmatpush.bf16.msrb.mxu3 %v4292_v53 }
 0x11f   : > { %1980 = vmatpush.bf16.msrb.mxu0 %v4304_v4 }
 0x120   : > { %v1420_v57 = vpop.f32.mrf.mxu0 }
 0x121   : > { %v1433_v58 = vpop.f32.mrf.mxu1 }
 0x122   : > { %v1434_v59 = vadd.f32 %v1433_v58, %v1420_v57 }
 0x128   : > { %v1422_v61 = vpop.f32.mrf.mxu0  ;;  %v1446_v62 = vpop.f32.mrf.mxu2 }
 0x129   : > { %v1459_v63 = vpop.f32.mrf.mxu3  ;;  %v1447_v0 = vadd.f32 %v1446_v62, %v1434_v59  ;;  %v1435_v1 = vpop.f32.mrf.mxu1  ;;  %v4428_v62 = vld [vmem:[%s4898_s20 + $0x1] ss:$0 sm:$0xff] }
 0x12b   : > { %v5058_v2 = vadd.f32 %v1459_v63, %v1447_v0  ;;  %v1823_v63 = vadd.f32 %v4428_v62, %v5053_v51  ;;  %v4300_v51 = vld [vmem:[%s4720_s23 + $0x40] sm:$0xff] }
 0x12d   : > { %v1824_v0 = vmax.f32 %v1823_v63, 0.0  ;;  %v2131_v53 = vadd.f32 %v4429_v50, %v5058_v2  ;;  %v4438_v2 = vld [vmem:[%s5106_s13 + $0x1] ss:$0 sm:$0xff]  ;;  %v4357_v50 = vld [vmem:[%s4720_s23 + $0xc8] sm:$0xff] }
 0x12f   : > { %v1825_v1 = vpack.c.bf16 %v1824_v0, %v1824_v0  ;;  %v2132_v54 = vmax.f32 %v2131_v53, 0.0  ;;  %v4356_v53 = vld [vmem:[%s4720_s23 + $0xc0] sm:$0xff] }
 0x130   : > { %v1448_v5 = vpop.f32.mrf.mxu2 }
 0x131   : > { %v1461_v6 = vpop.f32.mrf.mxu3  ;;  %v4303_v5 = vld [vmem:[%s4720_s23 + $0x58] sm:$0xff]  ;;  %v2133_v55 = vpack.c.bf16 %v2132_v54, %v2132_v54 }
 0x132   : > { %1981 = vmatpush.bf16.msrb.mxu0 %v4303_v5  ;;  %v4302_v6 = vld [vmem:[%s4720_s23 + $0x50] sm:$0xff] }
 0x136   : > { %1982 = vmatpush.bf16.msrb.mxu0 %v4302_v6 }
 0x13a   : > { %1983 = vmatpush.bf16.msrb.mxu0 %v4301_v7 }
 0x13e   : > { %1984 = vmatpush.bf16.msrb.mxu0 %v4300_v51  ;;  %v4343_v51 = vld [vmem:[%s5072_s11 + $0xb8] sm:$0xff] }
 0x140   : > { %v1472_v8 = vpop.f32.mrf.mxu0 }
 0x141   : > { %v1485_v9 = vpop.f32.mrf.mxu1 }
 0x142   : > { %v1486_v10 = vadd.f32 %v1485_v9, %v1472_v8  ;;  %v4315_v8 = vld [vmem:[%s5072_s11 + $0x78] sm:$0xff]  ;;  %v4314_v9 = vld [vmem:[%s5072_s11 + $0x70] sm:$0xff]  ;;  %2368 = vmatpush.bf16.msra.mxu0 %v4343_v51 }
 0x143   : > { %2060 = vmatpush.bf16.msrb.mxu1 %v4315_v8  ;;  %v4342_v8 = vld [vmem:[%s5072_s11 + $0xb0] sm:$0xff] }
 0x144   : > { %v4374_v51 = vld [vmem:[%s5093_s25 + $0x70] sm:$0xff] }
 0x146   : > { %2369 = vmatpush.bf16.msra.mxu0 %v4342_v8  ;;  %v4373_v8 = vld [vmem:[%s5093_s25 + $0x68] sm:$0xff] }
 0x147   : > { %2061 = vmatpush.bf16.msrb.mxu1 %v4314_v9  ;;  %v4341_v9 = vld [vmem:[%s5072_s11 + $0xa8] sm:$0xff] }
 0x148   : > { %v1498_v11 = vpop.f32.mrf.mxu2  ;;  %v1474_v12 = vpop.f32.mrf.mxu0 }
 0x149   : > { %v1499_v13 = vadd.f32 %v1498_v11, %v1486_v10  ;;  %v1511_v14 = vpop.f32.mrf.mxu3  ;;  %v1487_v16 = vpop.f32.mrf.mxu1  ;;  %v4313_v10 = vld [vmem:[%s5072_s11 + $0x68] sm:$0xff]  ;;  %v4312_v12 = vld [vmem:[%s5072_s11 + $0x60] sm:$0xff] }
 0x14a   : > { %v4310_v16 = vld [vmem:[%s5072_s11 + $0x50] sm:$0xff]  ;;  %2370 = vmatpush.bf16.msra.mxu0 %v4341_v9  ;;  %v4444_v9 = vld [vmem:[%s5051_s16 + $0x3] ss:$0 sm:$0xff] }
 0x14b   : > { %v5063_v15 = vadd.f32 %v1511_v14, %v1499_v13  ;;  %2062 = vmatpush.bf16.msrb.mxu1 %v4313_v10  ;;  %v4311_v13 = vld [vmem:[%s5072_s11 + $0x58] sm:$0xff]  ;;  %v4340_v10 = vld [vmem:[%s5072_s11 + $0xa0] sm:$0xff] }
 0x14e   : > { %2371 = vmatpush.bf16.msra.mxu0 %v4340_v10 }
 0x14f   : > { %2063 = vmatpush.bf16.msrb.mxu1 %v4312_v12  ;;  %v4339_v12 = vld [vmem:[%s5072_s11 + $0x98] sm:$0xff] }
 0x150   : > { %v1500_v17 = vpop.f32.mrf.mxu2 }
 0x151   : > { %v1513_v18 = vpop.f32.mrf.mxu3  ;;  %v4435_v17 = vld [vmem:[%s5042_s30 + $0x1] ss:$0 sm:$0xff] }
 0x152   : > { %2372 = vmatpush.bf16.msra.mxu0 %v4339_v12 }
 0x153   : > { %2064 = vmatpush.bf16.msrb.mxu1 %v4311_v13  ;;  %v4338_v13 = vld [vmem:[%s5072_s11 + $0x90] sm:$0xff] }
 0x156   : > { %2373 = vmatpush.bf16.msra.mxu0 %v4338_v13 }
 0x157   : > { %2065 = vmatpush.bf16.msrb.mxu1 %v4310_v16  ;;  %v4336_v16 = vld [vmem:[%s5072_s11 + $0x80] sm:$0xff] }
 0x15b   : > { %2066 = vmatpush.bf16.msrb.mxu1 %v4309_v23  ;;  %v4440_v23 = vld [vmem:[%s5051_s16 + $0x2] ss:$0 sm:$0xff] }
 0x15f   : > { %2067 = vmatpush.bf16.msrb.mxu1 %v4308_v24 }
 0x170   : > { %v1597_v49 = vpop.f32.mrf.mxu0 }
 0x171   : > { %v1598_v48 = vadd.f32 %v4431_v45, %v1597_v49  ;;  %v4317_v45 = vld [vmem:[%s5093_s25 + $0x28] sm:$0xff]  ;;  %v4316_v49 = vld [vmem:[%s5093_s25 + $0x20] sm:$0xff] }
 0x172   : > { %2120 = vmatpush.bf16.msrb.mxu2 %v4317_v45 }
 0x173   : > { %v1601_v52 = vmax.f32 %v1598_v48, 0.0  ;;  %v4327_v48 = vld [vmem:[%s5020_s28 + $0xb8] sm:$0xff] }
 0x175   : > { %v1602_v27 = vpack.c.bf16 %v1601_v52, %v1601_v52  ;;  %v4326_v52 = vld [vmem:[%s5020_s28 + $0xb0] sm:$0xff] }
 0x176   : > { %2121 = vmatpush.bf16.msrb.mxu2 %v4316_v49 }
 0x177   : > { %1678 = vmatmul.bf16.vlgmr.msra.gmra.mxu1 %v1602_v27  ;;  %v4436_v27 = vld [vmem:[%s5051_s16 + $0x1] ss:$0 sm:$0xff] }
 0x178   : > { %v1599_v28 = vpop.f32.mrf.mxu0 }
 0x1f4   : > { %v1679_v38 = vpop.f32.mrf.mxu1 }
 0x1f5   : > { %v1680_v39 = vadd.f32 %v4432_v37, %v1679_v38  ;;  %v4321_v37 = vld [vmem:[%s5020_s28 + $0x88] sm:$0xff]  ;;  %v4320_v38 = vld [vmem:[%s5020_s28 + $0x80] sm:$0xff] }
 0x1f7   : > { %v1683_v40 = vmax.f32 %v1680_v39, 0.0  ;;  %v4335_v39 = vld [vmem:[%s4720_s23 + $0xb8] sm:$0xff] }
 0x1f9   : > { %v1684_v41 = vpack.c.bf16 %v1683_v40, %v1683_v40  ;;  %v4334_v40 = vld [vmem:[%s4720_s23 + $0xb0] sm:$0xff] }
 0x1fb   : > { %1760 = vmatmul.bf16.vlgmr.msra.gmra.mxu2 %v1684_v41  ;;  %v4437_v41 = vld [vmem:[%s5085_s14 + $0x1] ss:$0 sm:$0xff] }
 0x1fc   : > { %v1681_v42 = vpop.f32.mrf.mxu1  ;;  %2202 = vmatpush.bf16.msra.mxu2 %v4327_v48  ;;  %v4353_v48 = vld [vmem:[%s5020_s28 + $0xe8] sm:$0xff] }
 0x200   : > { %2203 = vmatpush.bf16.msra.mxu2 %v4326_v52  ;;  %v4352_v52 = vld [vmem:[%s5020_s28 + $0xe0] sm:$0xff] }
 0x204   : > { %2204 = vmatpush.bf16.msra.mxu2 %v4325_v33  ;;  %v4441_v33 = vld [vmem:[%s5085_s14 + $0x2] ss:$0 sm:$0xff] }
 0x208   : > { %2205 = vmatpush.bf16.msra.mxu2 %v4324_v34 }
 0x20c   : > { %2206 = vmatpush.bf16.msra.mxu2 %v4323_v35 }
 0x210   : > { %2207 = vmatpush.bf16.msra.mxu2 %v4322_v36 }
 0x214   : > { %2208 = vmatpush.bf16.msra.mxu2 %v4321_v37 }
 0x218   : > { %2209 = vmatpush.bf16.msra.mxu2 %v4320_v38 }
 0x27e   : > { %v1761_v57 = vpop.f32.mrf.mxu2 }
 0x27f   : > { %v1762_v58 = vadd.f32 %v4433_v56, %v1761_v57  ;;  %v4333_v56 = vld [vmem:[%s4720_s23 + $0xa8] sm:$0xff]  ;;  %v4332_v57 = vld [vmem:[%s4720_s23 + $0xa0] sm:$0xff] }
 0x281   : > { %v1765_v59 = vmax.f32 %v1762_v58, 0.0  ;;  %v4331_v58 = vld [vmem:[%s4720_s23 + $0x98] sm:$0xff] }
 0x283   : > { %v1766_v60 = vpack.c.bf16 %v1765_v59, %v1765_v59  ;;  %v4330_v59 = vld [vmem:[%s4720_s23 + $0x90] sm:$0xff] }
 0x285   : > { %3590 = vmatmul.msk.bf16.vlgmr.msra.gmra.mxu3 %vm1802_vm0, %v1766_v60  ;;  %v4329_v60 = vld [vmem:[%s4720_s23 + $0x88] sm:$0xff] }
 0x286   : > { %v1763_v61 = vpop.f32.mrf.mxu2  ;;  %2285 = vmatpush.bf16.msra.mxu3 %v4335_v39  ;;  %v4430_v39 = vld [vmem:[%s4898_s20 + $0x3] ss:$0 sm:$0xff]  ;;  %s4552_s20 = smov 2  }
 0x287   : > { %v4328_v61 = vld [vmem:[%s4720_s23 + $0x80] sm:$0xff] }
 0x28a   : > { %2286 = vmatpush.bf16.msra.mxu3 %v4334_v40  ;;  %v2439_v40 = vadd.f32 %v4430_v39, %v5063_v15  ;;  %v4442_v15 = vld [vmem:[%s5106_s13 + $0x2] ss:$0 sm:$0xff] }
 0x28e   : > { %2287 = vmatpush.bf16.msra.mxu3 %v4333_v56 }
 0x292   : > { %2288 = vmatpush.bf16.msra.mxu3 %v4332_v57  ;;  %v4443_v57 = vld [vmem:[%s5042_s30 + $0x3] ss:$0 sm:$0xff] }
 0x295   : > { %1902 = vmatmul.bf16.vlgmr.msrb.gmra.mxu3 %v1825_v1  ;;  %v4439_v1 = vld [vmem:[%s5042_s30 + $0x2] ss:$0 sm:$0xff] }
 0x296   : > { %2289 = vmatpush.bf16.msra.mxu3 %v4331_v58 }
 0x29a   : > { %2290 = vmatpush.bf16.msra.mxu3 %v4330_v59 }
 0x29e   : > { %2291 = vmatpush.bf16.msra.mxu3 %v4329_v60 }
 0x2a2   : > { %2292 = vmatpush.bf16.msra.mxu3 %v4328_v61 }
 0x308   : > { %v5129_v11 = vpop.f32.mrf.mxu3 }
 0x310   : > { %v1817_v14 = vpop.f32.mrf.mxu3 }
 0x311   : > { %v4337_v14 = vld [vmem:[%s5072_s11 + $0x88] sm:$0xff] }
 0x312   : > { %2374 = vmatpush.bf16.msra.mxu0 %v4337_v14 }
 0x316   : > { %2375 = vmatpush.bf16.msra.mxu0 %v4336_v16 }
 0x318   : > { %v1903_v18 = vpop.f32.mrf.mxu3 }
 0x319   : > { %v1904_v19 = vadd.f32 %v4435_v17, %v1903_v18  ;;  %v4347_v17 = vld [vmem:[%s5093_s25 + $0x58] sm:$0xff]  ;;  %v4346_v18 = vld [vmem:[%s5093_s25 + $0x50] sm:$0xff] }
 0x31a   : > { %2426 = vmatpush.bf16.msra.mxu1 %v4347_v17  ;;  %v4372_v17 = vld [vmem:[%s5093_s25 + $0x60] sm:$0xff] }
 0x31b   : > { %v1907_v20 = vmax.f32 %v1904_v19, 0.0  ;;  %v4345_v19 = vld [vmem:[%s5093_s25 + $0x48] sm:$0xff] }
 0x31d   : > { %v1908_v21 = vpack.c.bf16 %v1907_v20, %v1907_v20  ;;  %v4344_v20 = vld [vmem:[%s5093_s25 + $0x40] sm:$0xff] }
 0x31e   : > { %2427 = vmatpush.bf16.msra.mxu1 %v4346_v18  ;;  %v4445_v18 = vld [vmem:[%s5085_s14 + $0x3] ss:$0 sm:$0xff] }
 0x31f   : > { %1985 = vmatmul.bf16.vlgmr.msrb.gmra.mxu0 %v1908_v21  ;;  %v4355_v21 = vld [vmem:[%s5020_s28 + $0xf8] sm:$0xff] }
 0x320   : > { %v1905_v22 = vpop.f32.mrf.mxu3 }
 0x321   : > { %v4354_v22 = vld [vmem:[%s5020_s28 + $0xf0] sm:$0xff] }
 0x322   : > { %2428 = vmatpush.bf16.msra.mxu1 %v4345_v19 }
 0x326   : > { %2429 = vmatpush.bf16.msra.mxu1 %v4344_v20 }
 0x39c   : > { %v1986_v28 = vpop.f32.mrf.mxu0 }
 0x39d   : > { %v1987_v29 = vadd.f32 %v4436_v27, %v1986_v28  ;;  %v4351_v27 = vld [vmem:[%s5020_s28 + $0xd8] sm:$0xff]  ;;  %v4350_v28 = vld [vmem:[%s5020_s28 + $0xd0] sm:$0xff] }
 0x39f   : > { %v1990_v30 = vmax.f32 %v1987_v29, 0.0  ;;  %v4349_v29 = vld [vmem:[%s5020_s28 + $0xc8] sm:$0xff] }
 0x3a1   : > { %v1991_v31 = vpack.c.bf16 %v1990_v30, %v1990_v30  ;;  %v4348_v30 = vld [vmem:[%s5020_s28 + $0xc0] sm:$0xff]  ;;  %s2964_s28 = sshll.u32 %s5267_s21, 1 }
 0x3a2   : > { %s525_s6 = scalar_lea.vmem %s5260_s17, %s2964_s28 }
 0x3a3   : > { %2068 = vmatmul.bf16.vlgmr.msrb.gmra.mxu1 %v1991_v31  ;;  %v4363_v31 = vld [vmem:[%s4720_s23 + $0xf8] sm:$0xff] }
 0x3a4   : > { %v1988_v32 = vpop.f32.mrf.mxu0  ;;  %2510 = vmatpush.bf16.msrb.mxu1 %v4355_v21 }
 0x3a5   : > { %v4362_v32 = vld [vmem:[%s4720_s23 + $0xf0] sm:$0xff] }
 0x3a8   : > { %2511 = vmatpush.bf16.msrb.mxu1 %v4354_v22 }
 0x3ac   : > { %2512 = vmatpush.bf16.msrb.mxu1 %v4353_v48  ;;  %v4434_v48 = vld [vmem:[%s5106_s13] ss:$0 sm:$0xff] }
 0x3b0   : > { %2513 = vmatpush.bf16.msrb.mxu1 %v4352_v52  ;;  %v1816_v52 = vadd.f32 %v4434_v48, %v5129_v11 }
 0x3b4   : > { %2514 = vmatpush.bf16.msrb.mxu1 %v4351_v27 }
 0x3b8   : > { %2515 = vmatpush.bf16.msrb.mxu1 %v4350_v28 }
 0x3bc   : > { %2516 = vmatpush.bf16.msrb.mxu1 %v4349_v29 }
 0x3c0   : > { %2517 = vmatpush.bf16.msrb.mxu1 %v4348_v30 }
 0x420   : > { %v2069_v42 = vpop.f32.mrf.mxu1 }
 0x421   : > { %v2070_v43 = vadd.f32 %v4437_v41, %v2069_v42  ;;  %v2440_v41 = vmax.f32 %v2439_v40, 0.0 }
 0x423   : > { %v2073_v44 = vmax.f32 %v2070_v43, 0.0  ;;  %v2441_v42 = vpack.c.bf16 %v2440_v41, %v2440_v41  ;;  %v4361_v43 = vld [vmem:[%s4720_s23 + $0xe8] sm:$0xff] }
 0x425   : > { %v2074_v46 = vpack.c.bf16 %v2073_v44, %v2073_v44  ;;  %v4360_v44 = vld [vmem:[%s4720_s23 + $0xe0] sm:$0xff] }
 0x427   : > { %3769 = vmatmul.msk.bf16.vlgmr.msrb.gmra.mxu2 %vm1802_vm0, %v2074_v46  ;;  %v4359_v46 = vld [vmem:[%s4720_s23 + $0xd8] sm:$0xff] }
 0x428   : > { %v2071_v47 = vpop.f32.mrf.mxu1  ;;  %2593 = vmatpush.bf16.msrb.mxu2 %v4363_v31 }
 0x429   : > { %v4358_v47 = vld [vmem:[%s4720_s23 + $0xd0] sm:$0xff]  ;;  %s4553_s23 = smov 3  }
 0x42c   : > { %2594 = vmatpush.bf16.msrb.mxu2 %v4362_v32 }
 0x430   : > { %2595 = vmatpush.bf16.msrb.mxu2 %v4361_v43 }
 0x434   : > { %2596 = vmatpush.bf16.msrb.mxu2 %v4360_v44 }
 0x437   : > { %2210 = vmatmul.bf16.vlgmr.msra.gmra.mxu2 %v2133_v55 }
 0x438   : > { %2597 = vmatpush.bf16.msrb.mxu2 %v4359_v46 }
 0x43c   : > { %2598 = vmatpush.bf16.msrb.mxu2 %v4358_v47 }
 0x440   : > { %2599 = vmatpush.bf16.msrb.mxu2 %v4357_v50 }
 0x444   : > { %2600 = vmatpush.bf16.msrb.mxu2 %v4356_v53 }
 0x4aa   : > { %v2123_v62 = vpop.f32.mrf.mxu2 }
 0x4ab   : > { %v2124_v63 = vadd.f32 %v4438_v2, %v2123_v62  ;;  %v4371_v62 = vld [vmem:[%s5072_s11 + $0xf8] sm:$0xff] }
 0x4ac   : > { %2676 = vmatpush.bf16.msrb.mxu3 %v4371_v62 }
 0x4ad   : > { %2744 = vrot.lane.b32.xlu0 %v2124_v63, %s4551_s22  ;;  %v4370_v63 = vld [vmem:[%s5072_s11 + $0xf0] sm:$0xff] }
 0x4b0   : > { %2677 = vmatpush.bf16.msrb.mxu3 %v4370_v63 }
 0x4b2   : > { %v2125_v0 = vpop.f32.mrf.mxu2 }
 0x4b3   : > { %v4369_v0 = vld [vmem:[%s5072_s11 + $0xe8] sm:$0xff] }
 0x4b4   : > { %2678 = vmatpush.bf16.msrb.mxu3 %v4369_v0 }
 0x4ba   : > { %v2211_v3 = vpop.f32.mrf.mxu2 }
 0x4bb   : > { %v2212_v4 = vadd.f32 %v4439_v1, %v2211_v3  ;;  %v4368_v1 = vld [vmem:[%s5072_s11 + $0xe0] sm:$0xff]  ;;  %v4367_v3 = vld [vmem:[%s5072_s11 + $0xd8] sm:$0xff] }
 0x4bc   : > { %2679 = vmatpush.bf16.msrb.mxu3 %v4368_v1 }
 0x4bd   : > { %v2215_v5 = vmax.f32 %v2212_v4, 0.0  ;;  %v4366_v4 = vld [vmem:[%s5072_s11 + $0xd0] sm:$0xff] }
 0x4bf   : > { %v2216_v6 = vpack.c.bf16 %v2215_v5, %v2215_v5  ;;  %v4365_v5 = vld [vmem:[%s5072_s11 + $0xc8] sm:$0xff] }
 0x4c0   : > { %2680 = vmatpush.bf16.msrb.mxu3 %v4367_v3 }
 0x4c1   : > { %2293 = vmatmul.bf16.vlgmr.msra.gmra.mxu3 %v2216_v6  ;;  %v4364_v6 = vld [vmem:[%s5072_s11 + $0xc0] sm:$0xff] }
 0x4c2   : > { %v2213_v7 = vpop.f32.mrf.mxu2 }
 0x4c3   : > { %v4375_v7 = vld [vmem:[%s5093_s25 + $0x78] sm:$0xff] }
 0x4c4   : > { %2681 = vmatpush.bf16.msrb.mxu3 %v4366_v4  ;;  %2734 = vmatpush.bf16.msrb.mxu0 %v4375_v7 }
 0x4c8   : > { %2682 = vmatpush.bf16.msrb.mxu3 %v4365_v5  ;;  %2735 = vmatpush.bf16.msrb.mxu0 %v4374_v51 }
 0x4cc   : > { %2683 = vmatpush.bf16.msrb.mxu3 %v4364_v6  ;;  %2736 = vmatpush.bf16.msrb.mxu0 %v4373_v8 }
 0x4d0   : > { %2737 = vmatpush.bf16.msrb.mxu0 %v4372_v17 }
 0x544   : > { %v2294_v24 = vpop.f32.mrf.mxu3 }
 0x545   : > { %v2295_v25 = vadd.f32 %v4440_v23, %v2294_v24  ;;  %v4446_v24 = vld [vmem:[%s5106_s13 + $0x3] ss:$0 sm:$0xff] }
 0x547   : > { %v2298_v26 = vmax.f32 %v2295_v25, 0.0 }
 0x549   : > { %v2299_v45 = vpack.c.bf16 %v2298_v26, %v2298_v26 }
 0x54b   : > { %2376 = vmatmul.bf16.vlgmr.msra.gmra.mxu0 %v2299_v45 }
 0x54c   : > { %v2296_v49 = vpop.f32.mrf.mxu3 }
 0x54d   : > { %v2745_v49 = vpop.permute.xlu0 %2744 }
 0x54e   : > { %v2756_v28 = vsel %vm2755_vm1, %v1816_v52, %v2745_v49 }
 0x5c8   : > { %v2377_v34 = vpop.f32.mrf.mxu0 }
 0x5c9   : > { %v2378_v35 = vadd.f32 %v4441_v33, %v2377_v34 }
 0x5cb   : > { %v2381_v36 = vmax.f32 %v2378_v35, 0.0 }
 0x5cd   : > { %v2382_v37 = vpack.c.bf16 %v2381_v36, %v2381_v36 }
 0x5cf   : > { %3948 = vmatmul.msk.bf16.vlgmr.msra.gmra.mxu1 %vm1802_vm0, %v2382_v37 }
 0x5d0   : > { %v2379_v38 = vpop.f32.mrf.mxu0 }
 0x5df   : > { %2518 = vmatmul.bf16.vlgmr.msrb.gmra.mxu1 %v2441_v42 }
 0x64c   : > { %v2431_v54 = vpop.f32.mrf.mxu1 }
 0x64d   : > { %v2432_v55 = vadd.f32 %v4442_v15, %v2431_v54 }
 0x64f   : > { %2748 = vrot.lane.b32.xlu0 %v2432_v55, %s4552_s20 }
 0x654   : > { %v2433_v56 = vpop.f32.mrf.mxu1 }
 0x65c   : > { %v2519_v58 = vpop.f32.mrf.mxu1 }
 0x65d   : > { %v2520_v59 = vadd.f32 %v4443_v57, %v2519_v58 }
 0x65f   : > { %v2523_v60 = vmax.f32 %v2520_v59, 0.0 }
 0x661   : > { %v2524_v61 = vpack.c.bf16 %v2523_v60, %v2523_v60 }
 0x663   : > { %2601 = vmatmul.bf16.vlgmr.msrb.gmra.mxu2 %v2524_v61 }
 0x664   : > { %v2521_v2 = vpop.f32.mrf.mxu1 }
 0x6c1   : > { %v2749_v27 = vpop.permute.xlu0 %2748 }
 0x6c2   : > { %v2758_v29 = vsel %vm2757_vm2, %v2756_v28, %v2749_v27 }
 0x6e6   : > { %v2602_v10 = vpop.f32.mrf.mxu2 }
 0x6e7   : > { %v2603_v12 = vadd.f32 %v4444_v9, %v2602_v10 }
 0x6e9   : > { %v2606_v13 = vmax.f32 %v2603_v12, 0.0 }
 0x6eb   : > { %v2607_v14 = vpack.c.bf16 %v2606_v13, %v2606_v13 }
 0x6ed   : > { %2684 = vmatmul.bf16.vlgmr.msrb.gmra.mxu3 %v2607_v14 }
 0x6ee   : > { %v2604_v16 = vpop.f32.mrf.mxu2 }
 0x770   : > { %v2685_v19 = vpop.f32.mrf.mxu3 }
 0x771   : > { %v2686_v20 = vadd.f32 %v4445_v18, %v2685_v19 }
 0x773   : > { %v2689_v21 = vmax.f32 %v2686_v20, 0.0 }
 0x775   : > { %v2690_v22 = vpack.c.bf16 %v2689_v21, %v2689_v21 }
 0x777   : > { %4127 = vmatmul.msk.bf16.vlgmr.msrb.gmra.mxu0 %vm1802_vm0, %v2690_v22 }
 0x778   : > { %v2687_v23 = vpop.f32.mrf.mxu3 }
 0x7f4   : > { %v2739_v25 = vpop.f32.mrf.mxu0 }
 0x7f5   : > { %v2740_v26 = vadd.f32 %v4446_v24, %v2739_v25 }
 0x7f7   : > { %2752 = vrot.lane.b32.xlu1 %v2740_v26, %s4553_s23 }
 0x7fc   : > { %v2741_v45 = vpop.f32.mrf.mxu0 }
 0x869   : > { %v2753_v30 = vpop.permute.xlu1 %2752 }
 0x86a   : > { %v2760_v31 = vsel %vm2759_vm3, %v2758_v29, %v2753_v30 }
 0x86b   : > { %2762 = vst.msk [vmem:[%s525_s6] sm:$0x3] %vm2761_vm4, %v2760_v31 }
 0x86c PF: > { %s5261_s20 = sld [smem:[#allocation9_spill]]  ;;  %s5264_s17 = smov %s4537_s18 }
 0x86d   : > { %s5262_s11 = sld [smem:[#allocation8_spill]] }
 0x86e   : > { %s5263_s19 = sld [smem:[#allocation10_spill]] }
 0x872   : > { %p24_p11 = scmp.ge.s32.totalorder %s5261_s20, 4  }
 0x873   : > { %s5265_s18 = smov %s5262_s11 }
 0x874   :  { %26 = sbr.rel (!%p24_p11) target bundleno = 8 (0x8), region = 158 }
 0x879   :  { %2782 = vsyncpa [#allocation3], 1 }
 0x87a   :  { %2784 = vsyncpa [#allocation3 + $0x1], 1 }
 0x87b   :  { %2785 = vsyncpa [#allocation5], 1 }
 0x87c   :  { %2787 = vsyncpa [#allocation5 + $0x1], 1 }

</bundles_post_ra>
